<compile_context>
chip_gen: v7x
topology: tpu7x:2x2x1
jax: 0.10.0
libtpu: 0.0.40
codegen_flags: <defaults>
</compile_context>

<pallas_src>
import functools

import jax
import jax.numpy as jnp
from jax.experimental import pallas as pl
from jax.experimental.pallas import tpu as pltpu


# ----------------------------------------------------------------------------
# Static geometry
# ----------------------------------------------------------------------------
IN_C, HW = 4, 16
C1, C2 = 8, 16
OH1 = HW - 2                    # 14 : conv1 output spatial
OH2 = (OH1 - 3) // 2 + 1        # 6  : conv2 output spatial
FEAT = C2 * OH2 * OH2           # 576
HID = 64
NA = 6

# Quad-parity ("space-to-depth by 2") grid used inside the kernel.
QG = HW // 2                    # 8   : quad grid is 8x8 per image
IMG_COLS = QG * QG              # 64  : columns per image in transposed layout
C1_VALID = 6 * QG + 7           # 55  : conv1 columns computed per image
C2_VALID = 5 * QG + 6           # 46  : conv2 columns computed per image


def _full_spec(shape):
    # whole-array block resident in VMEM (block_shape == full array dims)
    return pl.BlockSpec(shape, lambda: (0,) * len(shape))


# ----------------------------------------------------------------------------
# Fused kernel: conv1 + conv2 + dueling head
# ----------------------------------------------------------------------------
def _dqn_fused_kernel(xpt_ref, w1s_ref, b1_ref, w2s_ref, b2_ref,
                      whr_ref, b1h_ref, wva_ref, bva_ref,
                      q_ref, h1_ref, *, batch):
    """Whole DQN forward, fully VMEM-resident.

    xpt_ref : (16, batch*64) input, transposed quad-parity layout
              row = (h%2)*8 + (w%2)*4 + c_in,  col = n*64 + (h//2)*8 + (w//2)
    w1s_ref : (9, 8, 4)   conv1 per-tap weights: w1s[a*3+b, oc, c] = conv1_w[oc, c, a, b]
    b1_ref  : (8, 1)
    w2s_ref : (9, 16, 8)  conv2 per-tap weights (same convention)
    b2_ref  : (16, 1)
    whr_ref : (46, 1024)  head_w1 re-indexed onto the 8x8 quad grid; column = c*64+j
    b1h_ref : (1, 64)
    wva_ref : (64, 7)     merged [value | advantage] weights;  bva_ref: (1, 7)
    q_ref   : (batch, 6)  output
    h1_ref  : (32, (batch-1)*64 + 55) VMEM scratch holding conv1 output:
              row = p_h*16 + p_w*8 + oc,  col = n*64 + h2*8 + w2
              (conv1 value at spatial (2*h2 + p_h, 2*w2 + p_w))
    """
    w1_cols = (batch - 1) * IMG_COLS + C1_VALID
    w2_cols = (batch - 1) * IMG_COLS + C2_VALID

    # ---- conv1 (3x3, stride 1) + ReLU: one pass per output-parity class -----
    b1 = b1_ref[...]
    for p_h in range(2):
        for p_w in range(2):
            acc = None
            for a in range(3):
                for b in range(3):
                    rb = ((p_h + a) % 2) * 8 + ((p_w + b) % 2) * 4
                    off = ((p_h + a) // 2) * 8 + ((p_w + b) // 2)
                    x_slc = xpt_ref[rb:rb + 4, off:off + w1_cols]       # (4, w1_cols)
                    w_tap = w1s_ref[a * 3 + b]                          # (8, 4)
                    part = jnp.dot(w_tap, x_slc,
                                   preferred_element_type=jnp.float32)
                    acc = part if acc is None else acc + part
            r0 = p_h * 16 + p_w * 8
            h1_ref[r0:r0 + 8, :] = jnp.maximum(acc + b1, 0.0)

    # ---- conv2 (3x3, stride 2) + ReLU: 9 shifted matmuls, all images at once
    b2 = b2_ref[...]
    acc2 = None
    for i in range(3):
        for j in range(3):
            rb = (i % 2) * 16 + (j % 2) * 8
            off = (i // 2) * 8 + (j // 2)
            h_slc = h1_ref[rb:rb + 8, off:off + w2_cols]                # (8, w2_cols)
            w_tap = w2s_ref[i * 3 + j]                                  # (16, 8)
            part = jnp.dot(w_tap, h_slc, preferred_element_type=jnp.float32)
            acc2 = part if acc2 is None else acc2 + part
    c2t = jnp.maximum(acc2 + b2, 0.0)     # (16, w2_cols): channels x quad-grid spatial

    # ---- dueling head: hidden ReLU MLP + merged V/A matmul + combine --------
    whr = whr_ref[...]                    # (46, 16*64)
    b1h = b1h_ref[...]                    # (1, 64)
    wva = wva_ref[...]                    # (64, 7)
    bva = bva_ref[...]                    # (1, 7)
    for n in range(batch):
        feat_t = c2t[:, n * IMG_COLS:n * IMG_COLS + C2_VALID]           # (16, 46)
        g = jnp.dot(feat_t, whr, preferred_element_type=jnp.float32)    # (16, 1024)
        # hidden[j] = sum_c g[c, c*64 + j]  (block-diagonal extraction)
        hid = g[0:1, 0:HID]
        for c in range(1, C2):
            hid = hid + g[c:c + 1, c * HID:(c + 1) * HID]
        hid = jnp.maximum(hid + b1h, 0.0)                               # (1, 64)
        out = jnp.dot(hid, wva, preferred_element_type=jnp.float32) + bva  # (1, 7)
        v = out[:, 0:1]
        adv = out[:, 1:1 + NA]
        q_ref[n:n + 1, :] = v + adv - jnp.mean(adv, axis=-1, keepdims=True)


# ----------------------------------------------------------------------------
# One-time (init) parameter re-layout
# ----------------------------------------------------------------------------
def prepare_params(params):
    """Hoist all weight transposes / permutations out of the forward pass."""
    w1s = jnp.transpose(params['conv1_w'], (2, 3, 0, 1)).reshape(9, C1, IN_C)
    w2s = jnp.transpose(params['conv2_w'], (2, 3, 0, 1)).reshape(9, C2, C1)
    b1c = params['conv1_b'].reshape(C1, 1)
    b2c = params['conv2_b'].reshape(C2, 1)

    # head_w1 rows are indexed c*36 + oh*6 + ow (PyTorch NCHW flatten).
    # Re-index onto the kernel's 8x8 quad grid (e = oh*8 + ow), zero the
    # garbage columns (ow >= 6), and lay lanes out as c*64 + j.
    hw1 = params['head_w1'].reshape(C2, OH2 * OH2, HID)      # (16, 36, 64)
    e = jnp.arange(C2_VALID)
    oh, ow = e // QG, e % QG
    valid = ((ow < OH2) & (oh < OH2)).astype(hw1.dtype)
    s = jnp.clip(oh * OH2 + ow, 0, OH2 * OH2 - 1)
    whr = hw1[:, s, :] * valid[None, :, None]                # (16, 46, 64)
    whr = jnp.transpose(whr, (1, 0, 2)).reshape(C2_VALID, C2 * HID)

    wva = jnp.concatenate([params['head_wv'], params['head_wa']], axis=1)  # (64, 7)
    bva = jnp.concatenate([params['head_bv'], params['head_ba']], axis=1)  # (1, 7)
    return {'w1s': w1s, 'b1c': b1c, 'w2s': w2s, 'b2c': b2c,
            'whr': whr, 'b1h': params['head_b1'].reshape(1, HID),
            'wva': wva, 'bva': bva}


# ----------------------------------------------------------------------------
# DQN forward (single fused pallas_call)
# ----------------------------------------------------------------------------
def dqn_forward(prep, x, log=False, return_tuple=False):
    """x: (N, 4, 16, 16) NCHW float32 -> q: (N, 6)."""
    n = x.shape[0]
    # Input layout prep: NCHW -> transposed quad-parity layout (16, N*64).
    # Single cheap XLA op on an 8 KiB tensor (unavoidable glue).
    xpt = x.reshape(n, IN_C, QG, 2, QG, 2).transpose(3, 5, 1, 0, 2, 4)
    xpt = xpt.reshape(4 * IN_C, n * IMG_COLS)

    w1_cols = (n - 1) * IMG_COLS + C1_VALID
    kernel = functools.partial(_dqn_fused_kernel, batch=n)
    q = pl.pallas_call(
        kernel,
        out_shape=jax.ShapeDtypeStruct((n, NA), jnp.float32),
        in_specs=[_full_spec(xpt.shape),
                  _full_spec(prep['w1s'].shape), _full_spec(prep['b1c'].shape),
                  _full_spec(prep['w2s'].shape), _full_spec(prep['b2c'].shape),
                  _full_spec(prep['whr'].shape), _full_spec(prep['b1h'].shape),
                  _full_spec(prep['wva'].shape), _full_spec(prep['bva'].shape)],
        out_specs=_full_spec((n, NA)),
        scratch_shapes=[pltpu.VMEM((4 * C1, w1_cols), jnp.float32)],
    )(xpt, prep['w1s'], prep['b1c'], prep['w2s'], prep['b2c'],
      prep['whr'], prep['b1h'], prep['wva'], prep['bva'])

    if return_tuple:
        # TODO(synk): 'feat' stays VMEM-resident inside the fused kernel and is
        # not materialized; only the q (return_tuple=False) path is exposed.
        return {'raw': x, 'q': q}
    return q


# ----------------------------------------------------------------------------
# Deterministic parameter construction + pure-JAX reference check
# ----------------------------------------------------------------------------
def make_params(key, in_c=IN_C, hw=HW, hidden=HID, num_actions=NA):
    ks = jax.random.split(key, 10)
    c1, c2 = C1, C2
    oh1 = hw - 2
    oh2 = (oh1 - 3) // 2 + 1
    feat_dim = c2 * oh2 * oh2

    def u(k, shape, fan_in):
        bound = 1.0 / jnp.sqrt(fan_in)
        return jax.random.uniform(k, shape, jnp.float32, -bound, bound)

    return {
        'conv1_w': u(ks[0], (c1, in_c, 3, 3), in_c * 9),
        'conv1_b': u(ks[1], (c1,), in_c * 9),
        'conv2_w': u(ks[2], (c2, c1, 3, 3), c1 * 9),
        'conv2_b': u(ks[3], (c2,), c1 * 9),
        'head_w1': u(ks[4], (feat_dim, hidden), feat_dim),
        'head_b1': u(ks[5], (1, hidden), feat_dim),
        'head_wv': u(ks[6], (hidden, 1), hidden),
        'head_bv': u(ks[7], (1, 1), hidden),
        'head_wa': u(ks[8], (hidden, num_actions), hidden),
        'head_ba': u(ks[9], (1, num_actions), hidden),
    }


def dqn_reference(params, x):
    """Pure-JAX reference mirroring the PyTorch semantics."""
    h = jax.lax.conv_general_dilated(
        x, params['conv1_w'], (1, 1), 'VALID',
        dimension_numbers=('NCHW', 'OIHW', 'NCHW'))
    h = jax.nn.relu(h + params['conv1_b'][None, :, None, None])
    h = jax.lax.conv_general_dilated(
        h, params['conv2_w'], (2, 2), 'VALID',
        dimension_numbers=('NCHW', 'OIHW', 'NCHW'))
    h = jax.nn.relu(h + params['conv2_b'][None, :, None, None])
    feat = h.reshape(h.shape[0], -1)
    hid = jax.nn.relu(feat @ params['head_w1'] + params['head_b1'])
    v = hid @ params['head_wv'] + params['head_bv']
    a = hid @ params['head_wa'] + params['head_ba']
    return v + a - a.mean(axis=-1, keepdims=True)


if __name__ == "__main__":
    key = jax.random.PRNGKey(0)
    k_x, k_p = jax.random.split(key)
    x = jax.random.normal(k_x, (2, IN_C, HW, HW), dtype=jnp.float32)  # NCHW
    params = make_params(k_p)
    prep = prepare_params(params)          # init-time weight re-layout

    fwd = jax.jit(dqn_forward)
    q = jax.block_until_ready(fwd(prep, x))

    q_ref = dqn_reference(params, x)
    assert q.shape == q_ref.shape == (2, NA)
    err = float(jnp.max(jnp.abs(q - q_ref)))
    assert jnp.allclose(q, q_ref, atol=1e-3, rtol=1e-3), err

    print("KERNEL_OK")
</pallas_src>

<mosaic_0001>
module attributes {stable_mosaic.version = 11 : i64} {
  func.func @_dqn_fused_kernel(%arg0: memref<16x128xf32, #tpu.memory_space<vmem>>, %arg1: memref<9x8x4xf32, #tpu.memory_space<vmem>>, %arg2: memref<8x1xf32, #tpu.memory_space<vmem>>, %arg3: memref<9x16x8xf32, #tpu.memory_space<vmem>>, %arg4: memref<16x1xf32, #tpu.memory_space<vmem>>, %arg5: memref<46x1024xf32, #tpu.memory_space<vmem>>, %arg6: memref<1x64xf32, #tpu.memory_space<vmem>>, %arg7: memref<64x7xf32, #tpu.memory_space<vmem>>, %arg8: memref<1x7xf32, #tpu.memory_space<vmem>>, %arg9: memref<2x6xf32, #tpu.memory_space<vmem>>, %arg10: memref<32x119xf32, #tpu.memory_space<vmem>>) attributes {dimension_semantics = [], scalar_prefetch = 0 : i64, scratch_operands = 1 : i64, tpu.core_type = #tpu.core_type<tc>} {
    %c0 = arith.constant 0 : index
    %c0_0 = arith.constant 0 : index
    %0 = vector.load %arg2[%c0, %c0_0] : memref<8x1xf32, #tpu.memory_space<vmem>>, vector<8x1xf32>
    %c0_1 = arith.constant 0 : index
    %c0_2 = arith.constant 0 : index
    %1 = vector.load %arg0[%c0_1, %c0_2] : memref<16x128xf32, #tpu.memory_space<vmem>>, vector<4x119xf32>
    %c0_3 = arith.constant 0 : index
    %c0_4 = arith.constant 0 : index
    %c0_5 = arith.constant 0 : index
    %2 = vector.load %arg1[%c0_3, %c0_4, %c0_5] : memref<9x8x4xf32, #tpu.memory_space<vmem>>, vector<1x8x4xf32>
    %3 = vector.shape_cast %2 : vector<1x8x4xf32> to vector<8x4xf32>
    %cst = arith.constant dense<0.000000e+00> : vector<8x119xf32>
    %4 = tpu.matmul %3, %1, %cst {dimension_numbers = #tpu.dot_dimension_numbers<[1], [0], [0], [1], [0, 0, 1, 1], [], []>} : vector<8x4xf32>, vector<4x119xf32>, vector<8x119xf32> -> vector<8x119xf32>
    %c4 = arith.constant 4 : index
    %c0_6 = arith.constant 0 : index
    %5 = vector.load %arg0[%c4, %c0_6] : memref<16x128xf32, #tpu.memory_space<vmem>>, vector<4x119xf32>
    %c1 = arith.constant 1 : index
    %c0_7 = arith.constant 0 : index
    %c0_8 = arith.constant 0 : index
    %6 = vector.load %arg1[%c1, %c0_7, %c0_8] : memref<9x8x4xf32, #tpu.memory_space<vmem>>, vector<1x8x4xf32>
    %7 = vector.shape_cast %6 : vector<1x8x4xf32> to vector<8x4xf32>
    %cst_9 = arith.constant dense<0.000000e+00> : vector<8x119xf32>
    %8 = tpu.matmul %7, %5, %cst_9 {dimension_numbers = #tpu.dot_dimension_numbers<[1], [0], [0], [1], [0, 0, 1, 1], [], []>} : vector<8x4xf32>, vector<4x119xf32>, vector<8x119xf32> -> vector<8x119xf32>
    %9 = arith.addf %4, %8 : vector<8x119xf32>
    %c0_10 = arith.constant 0 : index
    %c1_11 = arith.constant 1 : index
    %10 = vector.load %arg0[%c0_10, %c1_11] : memref<16x128xf32, #tpu.memory_space<vmem>>, vector<4x119xf32>
    %c2 = arith.constant 2 : index
    %c0_12 = arith.constant 0 : index
    %c0_13 = arith.constant 0 : index
    %11 = vector.load %arg1[%c2, %c0_12, %c0_13] : memref<9x8x4xf32, #tpu.memory_space<vmem>>, vector<1x8x4xf32>
    %12 = vector.shape_cast %11 : vector<1x8x4xf32> to vector<8x4xf32>
    %cst_14 = arith.constant dense<0.000000e+00> : vector<8x119xf32>
    %13 = tpu.matmul %12, %10, %cst_14 {dimension_numbers = #tpu.dot_dimension_numbers<[1], [0], [0], [1], [0, 0, 1, 1], [], []>} : vector<8x4xf32>, vector<4x119xf32>, vector<8x119xf32> -> vector<8x119xf32>
    %14 = arith.addf %9, %13 : vector<8x119xf32>
    %c8 = arith.constant 8 : index
    %c0_15 = arith.constant 0 : index
    %15 = vector.load %arg0[%c8, %c0_15] : memref<16x128xf32, #tpu.memory_space<vmem>>, vector<4x119xf32>
    %c3 = arith.constant 3 : index
    %c0_16 = arith.constant 0 : index
    %c0_17 = arith.constant 0 : index
    %16 = vector.load %arg1[%c3, %c0_16, %c0_17] : memref<9x8x4xf32, #tpu.memory_space<vmem>>, vector<1x8x4xf32>
    %17 = vector.shape_cast %16 : vector<1x8x4xf32> to vector<8x4xf32>
    %cst_18 = arith.constant dense<0.000000e+00> : vector<8x119xf32>
    %18 = tpu.matmul %17, %15, %cst_18 {dimension_numbers = #tpu.dot_dimension_numbers<[1], [0], [0], [1], [0, 0, 1, 1], [], []>} : vector<8x4xf32>, vector<4x119xf32>, vector<8x119xf32> -> vector<8x119xf32>
    %19 = arith.addf %14, %18 : vector<8x119xf32>
    %c12 = arith.constant 12 : index
    %c0_19 = arith.constant 0 : index
    %20 = vector.load %arg0[%c12, %c0_19] : memref<16x128xf32, #tpu.memory_space<vmem>>, vector<4x119xf32>
    %c4_20 = arith.constant 4 : index
    %c0_21 = arith.constant 0 : index
    %c0_22 = arith.constant 0 : index
    %21 = vector.load %arg1[%c4_20, %c0_21, %c0_22] : memref<9x8x4xf32, #tpu.memory_space<vmem>>, vector<1x8x4xf32>
    %22 = vector.shape_cast %21 : vector<1x8x4xf32> to vector<8x4xf32>
    %cst_23 = arith.constant dense<0.000000e+00> : vector<8x119xf32>
    %23 = tpu.matmul %22, %20, %cst_23 {dimension_numbers = #tpu.dot_dimension_numbers<[1], [0], [0], [1], [0, 0, 1, 1], [], []>} : vector<8x4xf32>, vector<4x119xf32>, vector<8x119xf32> -> vector<8x119xf32>
    %24 = arith.addf %19, %23 : vector<8x119xf32>
    %c8_24 = arith.constant 8 : index
    %c1_25 = arith.constant 1 : index
    %25 = vector.load %arg0[%c8_24, %c1_25] : memref<16x128xf32, #tpu.memory_space<vmem>>, vector<4x119xf32>
    %c5 = arith.constant 5 : index
    %c0_26 = arith.constant 0 : index
    %c0_27 = arith.constant 0 : index
    %26 = vector.load %arg1[%c5, %c0_26, %c0_27] : memref<9x8x4xf32, #tpu.memory_space<vmem>>, vector<1x8x4xf32>
    %27 = vector.shape_cast %26 : vector<1x8x4xf32> to vector<8x4xf32>
    %cst_28 = arith.constant dense<0.000000e+00> : vector<8x119xf32>
    %28 = tpu.matmul %27, %25, %cst_28 {dimension_numbers = #tpu.dot_dimension_numbers<[1], [0], [0], [1], [0, 0, 1, 1], [], []>} : vector<8x4xf32>, vector<4x119xf32>, vector<8x119xf32> -> vector<8x119xf32>
    %29 = arith.addf %24, %28 : vector<8x119xf32>
    %c0_29 = arith.constant 0 : index
    %c8_30 = arith.constant 8 : index
    %30 = vector.load %arg0[%c0_29, %c8_30] : memref<16x128xf32, #tpu.memory_space<vmem>>, vector<4x119xf32>
    %c6 = arith.constant 6 : index
    %c0_31 = arith.constant 0 : index
    %c0_32 = arith.constant 0 : index
    %31 = vector.load %arg1[%c6, %c0_31, %c0_32] : memref<9x8x4xf32, #tpu.memory_space<vmem>>, vector<1x8x4xf32>
    %32 = vector.shape_cast %31 : vector<1x8x4xf32> to vector<8x4xf32>
    %cst_33 = arith.constant dense<0.000000e+00> : vector<8x119xf32>
    %33 = tpu.matmul %32, %30, %cst_33 {dimension_numbers = #tpu.dot_dimension_numbers<[1], [0], [0], [1], [0, 0, 1, 1], [], []>} : vector<8x4xf32>, vector<4x119xf32>, vector<8x119xf32> -> vector<8x119xf32>
    %34 = arith.addf %29, %33 : vector<8x119xf32>
    %c4_34 = arith.constant 4 : index
    %c8_35 = arith.constant 8 : index
    %35 = vector.load %arg0[%c4_34, %c8_35] : memref<16x128xf32, #tpu.memory_space<vmem>>, vector<4x119xf32>
    %c7 = arith.constant 7 : index
    %c0_36 = arith.constant 0 : index
    %c0_37 = arith.constant 0 : index
    %36 = vector.load %arg1[%c7, %c0_36, %c0_37] : memref<9x8x4xf32, #tpu.memory_space<vmem>>, vector<1x8x4xf32>
    %37 = vector.shape_cast %36 : vector<1x8x4xf32> to vector<8x4xf32>
    %cst_38 = arith.constant dense<0.000000e+00> : vector<8x119xf32>
    %38 = tpu.matmul %37, %35, %cst_38 {dimension_numbers = #tpu.dot_dimension_numbers<[1], [0], [0], [1], [0, 0, 1, 1], [], []>} : vector<8x4xf32>, vector<4x119xf32>, vector<8x119xf32> -> vector<8x119xf32>
    %39 = arith.addf %34, %38 : vector<8x119xf32>
    %c0_39 = arith.constant 0 : index
    %c9 = arith.constant 9 : index
    %40 = vector.load %arg0[%c0_39, %c9] : memref<16x128xf32, #tpu.memory_space<vmem>>, vector<4x119xf32>
    %c8_40 = arith.constant 8 : index
    %c0_41 = arith.constant 0 : index
    %c0_42 = arith.constant 0 : index
    %41 = vector.load %arg1[%c8_40, %c0_41, %c0_42] : memref<9x8x4xf32, #tpu.memory_space<vmem>>, vector<1x8x4xf32>
    %42 = vector.shape_cast %41 : vector<1x8x4xf32> to vector<8x4xf32>
    %cst_43 = arith.constant dense<0.000000e+00> : vector<8x119xf32>
    %43 = tpu.matmul %42, %40, %cst_43 {dimension_numbers = #tpu.dot_dimension_numbers<[1], [0], [0], [1], [0, 0, 1, 1], [], []>} : vector<8x4xf32>, vector<4x119xf32>, vector<8x119xf32> -> vector<8x119xf32>
    %44 = arith.addf %39, %43 : vector<8x119xf32>
    %45 = vector.broadcast %0 : vector<8x1xf32> to vector<8x119xf32>
    %46 = arith.addf %44, %45 : vector<8x119xf32>
    %cst_44 = arith.constant 0.000000e+00 : f32
    %47 = vector.broadcast %cst_44 : f32 to vector<8x119xf32>
    %48 = arith.maximumf %46, %47 : vector<8x119xf32>
    %c0_45 = arith.constant 0 : index
    %c0_46 = arith.constant 0 : index
    %49 = vector.load %arg10[%c0_45, %c0_46] : memref<32x119xf32, #tpu.memory_space<vmem>>, vector<8x119xf32>
    tpu.vector_store %arg10[%c0_45, %c0_46], %48 {strides = array<i32>} : memref<32x119xf32, #tpu.memory_space<vmem>>, vector<8x119xf32>,
    %c4_47 = arith.constant 4 : index
    %c0_48 = arith.constant 0 : index
    %50 = vector.load %arg0[%c4_47, %c0_48] : memref<16x128xf32, #tpu.memory_space<vmem>>, vector<4x119xf32>
    %c0_49 = arith.constant 0 : index
    %c0_50 = arith.constant 0 : index
    %c0_51 = arith.constant 0 : index
    %51 = vector.load %arg1[%c0_49, %c0_50, %c0_51] : memref<9x8x4xf32, #tpu.memory_space<vmem>>, vector<1x8x4xf32>
    %52 = vector.shape_cast %51 : vector<1x8x4xf32> to vector<8x4xf32>
    %cst_52 = arith.constant dense<0.000000e+00> : vector<8x119xf32>
    %53 = tpu.matmul %52, %50, %cst_52 {dimension_numbers = #tpu.dot_dimension_numbers<[1], [0], [0], [1], [0, 0, 1, 1], [], []>} : vector<8x4xf32>, vector<4x119xf32>, vector<8x119xf32> -> vector<8x119xf32>
    %c0_53 = arith.constant 0 : index
    %c1_54 = arith.constant 1 : index
    %54 = vector.load %arg0[%c0_53, %c1_54] : memref<16x128xf32, #tpu.memory_space<vmem>>, vector<4x119xf32>
    %c1_55 = arith.constant 1 : index
    %c0_56 = arith.constant 0 : index
    %c0_57 = arith.constant 0 : index
    %55 = vector.load %arg1[%c1_55, %c0_56, %c0_57] : memref<9x8x4xf32, #tpu.memory_space<vmem>>, vector<1x8x4xf32>
    %56 = vector.shape_cast %55 : vector<1x8x4xf32> to vector<8x4xf32>
    %cst_58 = arith.constant dense<0.000000e+00> : vector<8x119xf32>
    %57 = tpu.matmul %56, %54, %cst_58 {dimension_numbers = #tpu.dot_dimension_numbers<[1], [0], [0], [1], [0, 0, 1, 1], [], []>} : vector<8x4xf32>, vector<4x119xf32>, vector<8x119xf32> -> vector<8x119xf32>
    %58 = arith.addf %53, %57 : vector<8x119xf32>
    %c4_59 = arith.constant 4 : index
    %c1_60 = arith.constant 1 : index
    %59 = vector.load %arg0[%c4_59, %c1_60] : memref<16x128xf32, #tpu.memory_space<vmem>>, vector<4x119xf32>
    %c2_61 = arith.constant 2 : index
    %c0_62 = arith.constant 0 : index
    %c0_63 = arith.constant 0 : index
    %60 = vector.load %arg1[%c2_61, %c0_62, %c0_63] : memref<9x8x4xf32, #tpu.memory_space<vmem>>, vector<1x8x4xf32>
    %61 = vector.shape_cast %60 : vector<1x8x4xf32> to vector<8x4xf32>
    %cst_64 = arith.constant dense<0.000000e+00> : vector<8x119xf32>
    %62 = tpu.matmul %61, %59, %cst_64 {dimension_numbers = #tpu.dot_dimension_numbers<[1], [0], [0], [1], [0, 0, 1, 1], [], []>} : vector<8x4xf32>, vector<4x119xf32>, vector<8x119xf32> -> vector<8x119xf32>
    %63 = arith.addf %58, %62 : vector<8x119xf32>
    %c12_65 = arith.constant 12 : index
    %c0_66 = arith.constant 0 : index
    %64 = vector.load %arg0[%c12_65, %c0_66] : memref<16x128xf32, #tpu.memory_space<vmem>>, vector<4x119xf32>
    %c3_67 = arith.constant 3 : index
    %c0_68 = arith.constant 0 : index
    %c0_69 = arith.constant 0 : index
    %65 = vector.load %arg1[%c3_67, %c0_68, %c0_69] : memref<9x8x4xf32, #tpu.memory_space<vmem>>, vector<1x8x4xf32>
    %66 = vector.shape_cast %65 : vector<1x8x4xf32> to vector<8x4xf32>
    %cst_70 = arith.constant dense<0.000000e+00> : vector<8x119xf32>
    %67 = tpu.matmul %66, %64, %cst_70 {dimension_numbers = #tpu.dot_dimension_numbers<[1], [0], [0], [1], [0, 0, 1, 1], [], []>} : vector<8x4xf32>, vector<4x119xf32>, vector<8x119xf32> -> vector<8x119xf32>
    %68 = arith.addf %63, %67 : vector<8x119xf32>
    %c8_71 = arith.constant 8 : index
    %c1_72 = arith.constant 1 : index
    %69 = vector.load %arg0[%c8_71, %c1_72] : memref<16x128xf32, #tpu.memory_space<vmem>>, vector<4x119xf32>
    %c4_73 = arith.constant 4 : index
    %c0_74 = arith.constant 0 : index
    %c0_75 = arith.constant 0 : index
    %70 = vector.load %arg1[%c4_73, %c0_74, %c0_75] : memref<9x8x4xf32, #tpu.memory_space<vmem>>, vector<1x8x4xf32>
    %71 = vector.shape_cast %70 : vector<1x8x4xf32> to vector<8x4xf32>
    %cst_76 = arith.constant dense<0.000000e+00> : vector<8x119xf32>
    %72 = tpu.matmul %71, %69, %cst_76 {dimension_numbers = #tpu.dot_dimension_numbers<[1], [0], [0], [1], [0, 0, 1, 1], [], []>} : vector<8x4xf32>, vector<4x119xf32>, vector<8x119xf32> -> vector<8x119xf32>
    %73 = arith.addf %68, %72 : vector<8x119xf32>
    %c12_77 = arith.constant 12 : index
    %c1_78 = arith.constant 1 : index
    %74 = vector.load %arg0[%c12_77, %c1_78] : memref<16x128xf32, #tpu.memory_space<vmem>>, vector<4x119xf32>
    %c5_79 = arith.constant 5 : index
    %c0_80 = arith.constant 0 : index
    %c0_81 = arith.constant 0 : index
    %75 = vector.load %arg1[%c5_79, %c0_80, %c0_81] : memref<9x8x4xf32, #tpu.memory_space<vmem>>, vector<1x8x4xf32>
    %76 = vector.shape_cast %75 : vector<1x8x4xf32> to vector<8x4xf32>
    %cst_82 = arith.constant dense<0.000000e+00> : vector<8x119xf32>
    %77 = tpu.matmul %76, %74, %cst_82 {dimension_numbers = #tpu.dot_dimension_numbers<[1], [0], [0], [1], [0, 0, 1, 1], [], []>} : vector<8x4xf32>, vector<4x119xf32>, vector<8x119xf32> -> vector<8x119xf32>
    %78 = arith.addf %73, %77 : vector<8x119xf32>
    %c4_83 = arith.constant 4 : index
    %c8_84 = arith.constant 8 : index
    %79 = vector.load %arg0[%c4_83, %c8_84] : memref<16x128xf32, #tpu.memory_space<vmem>>, vector<4x119xf32>
    %c6_85 = arith.constant 6 : index
    %c0_86 = arith.constant 0 : index
    %c0_87 = arith.constant 0 : index
    %80 = vector.load %arg1[%c6_85, %c0_86, %c0_87] : memref<9x8x4xf32, #tpu.memory_space<vmem>>, vector<1x8x4xf32>
    %81 = vector.shape_cast %80 : vector<1x8x4xf32> to vector<8x4xf32>
    %cst_88 = arith.constant dense<0.000000e+00> : vector<8x119xf32>
    %82 = tpu.matmul %81, %79, %cst_88 {dimension_numbers = #tpu.dot_dimension_numbers<[1], [0], [0], [1], [0, 0, 1, 1], [], []>} : vector<8x4xf32>, vector<4x119xf32>, vector<8x119xf32> -> vector<8x119xf32>
    %83 = arith.addf %78, %82 : vector<8x119xf32>
    %c0_89 = arith.constant 0 : index
    %c9_90 = arith.constant 9 : index
    %84 = vector.load %arg0[%c0_89, %c9_90] : memref<16x128xf32, #tpu.memory_space<vmem>>, vector<4x119xf32>
    %c7_91 = arith.constant 7 : index
    %c0_92 = arith.constant 0 : index
    %c0_93 = arith.constant 0 : index
    %85 = vector.load %arg1[%c7_91, %c0_92, %c0_93] : memref<9x8x4xf32, #tpu.memory_space<vmem>>, vector<1x8x4xf32>
    %86 = vector.shape_cast %85 : vector<1x8x4xf32> to vector<8x4xf32>
    %cst_94 = arith.constant dense<0.000000e+00> : vector<8x119xf32>
    %87 = tpu.matmul %86, %84, %cst_94 {dimension_numbers = #tpu.dot_dimension_numbers<[1], [0], [0], [1], [0, 0, 1, 1], [], []>} : vector<8x4xf32>, vector<4x119xf32>, vector<8x119xf32> -> vector<8x119xf32>
    %88 = arith.addf %83, %87 : vector<8x119xf32>
    %c4_95 = arith.constant 4 : index
    %c9_96 = arith.constant 9 : index
    %89 = vector.load %arg0[%c4_95, %c9_96] : memref<16x128xf32, #tpu.memory_space<vmem>>, vector<4x119xf32>
    %c8_97 = arith.constant 8 : index
    %c0_98 = arith.constant 0 : index
    %c0_99 = arith.constant 0 : index
    %90 = vector.load %arg1[%c8_97, %c0_98, %c0_99] : memref<9x8x4xf32, #tpu.memory_space<vmem>>, vector<1x8x4xf32>
    %91 = vector.shape_cast %90 : vector<1x8x4xf32> to vector<8x4xf32>
    %cst_100 = arith.constant dense<0.000000e+00> : vector<8x119xf32>
    %92 = tpu.matmul %91, %89, %cst_100 {dimension_numbers = #tpu.dot_dimension_numbers<[1], [0], [0], [1], [0, 0, 1, 1], [], []>} : vector<8x4xf32>, vector<4x119xf32>, vector<8x119xf32> -> vector<8x119xf32>
    %93 = arith.addf %88, %92 : vector<8x119xf32>
    %94 = vector.broadcast %0 : vector<8x1xf32> to vector<8x119xf32>
    %95 = arith.addf %93, %94 : vector<8x119xf32>
    %cst_101 = arith.constant 0.000000e+00 : f32
    %96 = vector.broadcast %cst_101 : f32 to vector<8x119xf32>
    %97 = arith.maximumf %95, %96 : vector<8x119xf32>
    %c8_102 = arith.constant 8 : index
    %c0_103 = arith.constant 0 : index
    %98 = vector.load %arg10[%c8_102, %c0_103] : memref<32x119xf32, #tpu.memory_space<vmem>>, vector<8x119xf32>
    tpu.vector_store %arg10[%c8_102, %c0_103], %97 {strides = array<i32>} : memref<32x119xf32, #tpu.memory_space<vmem>>, vector<8x119xf32>,
    %c8_104 = arith.constant 8 : index
    %c0_105 = arith.constant 0 : index
    %99 = vector.load %arg0[%c8_104, %c0_105] : memref<16x128xf32, #tpu.memory_space<vmem>>, vector<4x119xf32>
    %c0_106 = arith.constant 0 : index
    %c0_107 = arith.constant 0 : index
    %c0_108 = arith.constant 0 : index
    %100 = vector.load %arg1[%c0_106, %c0_107, %c0_108] : memref<9x8x4xf32, #tpu.memory_space<vmem>>, vector<1x8x4xf32>
    %101 = vector.shape_cast %100 : vector<1x8x4xf32> to vector<8x4xf32>
    %cst_109 = arith.constant dense<0.000000e+00> : vector<8x119xf32>
    %102 = tpu.matmul %101, %99, %cst_109 {dimension_numbers = #tpu.dot_dimension_numbers<[1], [0], [0], [1], [0, 0, 1, 1], [], []>} : vector<8x4xf32>, vector<4x119xf32>, vector<8x119xf32> -> vector<8x119xf32>
    %c12_110 = arith.constant 12 : index
    %c0_111 = arith.constant 0 : index
    %103 = vector.load %arg0[%c12_110, %c0_111] : memref<16x128xf32, #tpu.memory_space<vmem>>, vector<4x119xf32>
    %c1_112 = arith.constant 1 : index
    %c0_113 = arith.constant 0 : index
    %c0_114 = arith.constant 0 : index
    %104 = vector.load %arg1[%c1_112, %c0_113, %c0_114] : memref<9x8x4xf32, #tpu.memory_space<vmem>>, vector<1x8x4xf32>
    %105 = vector.shape_cast %104 : vector<1x8x4xf32> to vector<8x4xf32>
    %cst_115 = arith.constant dense<0.000000e+00> : vector<8x119xf32>
    %106 = tpu.matmul %105, %103, %cst_115 {dimension_numbers = #tpu.dot_dimension_numbers<[1], [0], [0], [1], [0, 0, 1, 1], [], []>} : vector<8x4xf32>, vector<4x119xf32>, vector<8x119xf32> -> vector<8x119xf32>
    %107 = arith.addf %102, %106 : vector<8x119xf32>
    %c8_116 = arith.constant 8 : index
    %c1_117 = arith.constant 1 : index
    %108 = vector.load %arg0[%c8_116, %c1_117] : memref<16x128xf32, #tpu.memory_space<vmem>>, vector<4x119xf32>
    %c2_118 = arith.constant 2 : index
    %c0_119 = arith.constant 0 : index
    %c0_120 = arith.constant 0 : index
    %109 = vector.load %arg1[%c2_118, %c0_119, %c0_120] : memref<9x8x4xf32, #tpu.memory_space<vmem>>, vector<1x8x4xf32>
    %110 = vector.shape_cast %109 : vector<1x8x4xf32> to vector<8x4xf32>
    %cst_121 = arith.constant dense<0.000000e+00> : vector<8x119xf32>
    %111 = tpu.matmul %110, %108, %cst_121 {dimension_numbers = #tpu.dot_dimension_numbers<[1], [0], [0], [1], [0, 0, 1, 1], [], []>} : vector<8x4xf32>, vector<4x119xf32>, vector<8x119xf32> -> vector<8x119xf32>
    %112 = arith.addf %107, %111 : vector<8x119xf32>
    %c0_122 = arith.constant 0 : index
    %c8_123 = arith.constant 8 : index
    %113 = vector.load %arg0[%c0_122, %c8_123] : memref<16x128xf32, #tpu.memory_space<vmem>>, vector<4x119xf32>
    %c3_124 = arith.constant 3 : index
    %c0_125 = arith.constant 0 : index
    %c0_126 = arith.constant 0 : index
    %114 = vector.load %arg1[%c3_124, %c0_125, %c0_126] : memref<9x8x4xf32, #tpu.memory_space<vmem>>, vector<1x8x4xf32>
    %115 = vector.shape_cast %114 : vector<1x8x4xf32> to vector<8x4xf32>
    %cst_127 = arith.constant dense<0.000000e+00> : vector<8x119xf32>
    %116 = tpu.matmul %115, %113, %cst_127 {dimension_numbers = #tpu.dot_dimension_numbers<[1], [0], [0], [1], [0, 0, 1, 1], [], []>} : vector<8x4xf32>, vector<4x119xf32>, vector<8x119xf32> -> vector<8x119xf32>
    %117 = arith.addf %112, %116 : vector<8x119xf32>
    %c4_128 = arith.constant 4 : index
    %c8_129 = arith.constant 8 : index
    %118 = vector.load %arg0[%c4_128, %c8_129] : memref<16x128xf32, #tpu.memory_space<vmem>>, vector<4x119xf32>
    %c4_130 = arith.constant 4 : index
    %c0_131 = arith.constant 0 : index
    %c0_132 = arith.constant 0 : index
    %119 = vector.load %arg1[%c4_130, %c0_131, %c0_132] : memref<9x8x4xf32, #tpu.memory_space<vmem>>, vector<1x8x4xf32>
    %120 = vector.shape_cast %119 : vector<1x8x4xf32> to vector<8x4xf32>
    %cst_133 = arith.constant dense<0.000000e+00> : vector<8x119xf32>
    %121 = tpu.matmul %120, %118, %cst_133 {dimension_numbers = #tpu.dot_dimension_numbers<[1], [0], [0], [1], [0, 0, 1, 1], [], []>} : vector<8x4xf32>, vector<4x119xf32>, vector<8x119xf32> -> vector<8x119xf32>
    %122 = arith.addf %117, %121 : vector<8x119xf32>
    %c0_134 = arith.constant 0 : index
    %c9_135 = arith.constant 9 : index
    %123 = vector.load %arg0[%c0_134, %c9_135] : memref<16x128xf32, #tpu.memory_space<vmem>>, vector<4x119xf32>
    %c5_136 = arith.constant 5 : index
    %c0_137 = arith.constant 0 : index
    %c0_138 = arith.constant 0 : index
    %124 = vector.load %arg1[%c5_136, %c0_137, %c0_138] : memref<9x8x4xf32, #tpu.memory_space<vmem>>, vector<1x8x4xf32>
    %125 = vector.shape_cast %124 : vector<1x8x4xf32> to vector<8x4xf32>
    %cst_139 = arith.constant dense<0.000000e+00> : vector<8x119xf32>
    %126 = tpu.matmul %125, %123, %cst_139 {dimension_numbers = #tpu.dot_dimension_numbers<[1], [0], [0], [1], [0, 0, 1, 1], [], []>} : vector<8x4xf32>, vector<4x119xf32>, vector<8x119xf32> -> vector<8x119xf32>
    %127 = arith.addf %122, %126 : vector<8x119xf32>
    %c8_140 = arith.constant 8 : index
    %c8_141 = arith.constant 8 : index
    %128 = vector.load %arg0[%c8_140, %c8_141] : memref<16x128xf32, #tpu.memory_space<vmem>>, vector<4x119xf32>
    %c6_142 = arith.constant 6 : index
    %c0_143 = arith.constant 0 : index
    %c0_144 = arith.constant 0 : index
    %129 = vector.load %arg1[%c6_142, %c0_143, %c0_144] : memref<9x8x4xf32, #tpu.memory_space<vmem>>, vector<1x8x4xf32>
    %130 = vector.shape_cast %129 : vector<1x8x4xf32> to vector<8x4xf32>
    %cst_145 = arith.constant dense<0.000000e+00> : vector<8x119xf32>
    %131 = tpu.matmul %130, %128, %cst_145 {dimension_numbers = #tpu.dot_dimension_numbers<[1], [0], [0], [1], [0, 0, 1, 1], [], []>} : vector<8x4xf32>, vector<4x119xf32>, vector<8x119xf32> -> vector<8x119xf32>
    %132 = arith.addf %127, %131 : vector<8x119xf32>
    %c12_146 = arith.constant 12 : index
    %c8_147 = arith.constant 8 : index
    %133 = vector.load %arg0[%c12_146, %c8_147] : memref<16x128xf32, #tpu.memory_space<vmem>>, vector<4x119xf32>
    %c7_148 = arith.constant 7 : index
    %c0_149 = arith.constant 0 : index
    %c0_150 = arith.constant 0 : index
    %134 = vector.load %arg1[%c7_148, %c0_149, %c0_150] : memref<9x8x4xf32, #tpu.memory_space<vmem>>, vector<1x8x4xf32>
    %135 = vector.shape_cast %134 : vector<1x8x4xf32> to vector<8x4xf32>
    %cst_151 = arith.constant dense<0.000000e+00> : vector<8x119xf32>
    %136 = tpu.matmul %135, %133, %cst_151 {dimension_numbers = #tpu.dot_dimension_numbers<[1], [0], [0], [1], [0, 0, 1, 1], [], []>} : vector<8x4xf32>, vector<4x119xf32>, vector<8x119xf32> -> vector<8x119xf32>
    %137 = arith.addf %132, %136 : vector<8x119xf32>
    %c8_152 = arith.constant 8 : index
    %c9_153 = arith.constant 9 : index
    %138 = vector.load %arg0[%c8_152, %c9_153] : memref<16x128xf32, #tpu.memory_space<vmem>>, vector<4x119xf32>
    %c8_154 = arith.constant 8 : index
    %c0_155 = arith.constant 0 : index
    %c0_156 = arith.constant 0 : index
    %139 = vector.load %arg1[%c8_154, %c0_155, %c0_156] : memref<9x8x4xf32, #tpu.memory_space<vmem>>, vector<1x8x4xf32>
    %140 = vector.shape_cast %139 : vector<1x8x4xf32> to vector<8x4xf32>
    %cst_157 = arith.constant dense<0.000000e+00> : vector<8x119xf32>
    %141 = tpu.matmul %140, %138, %cst_157 {dimension_numbers = #tpu.dot_dimension_numbers<[1], [0], [0], [1], [0, 0, 1, 1], [], []>} : vector<8x4xf32>, vector<4x119xf32>, vector<8x119xf32> -> vector<8x119xf32>
    %142 = arith.addf %137, %141 : vector<8x119xf32>
    %143 = vector.broadcast %0 : vector<8x1xf32> to vector<8x119xf32>
    %144 = arith.addf %142, %143 : vector<8x119xf32>
    %cst_158 = arith.constant 0.000000e+00 : f32
    %145 = vector.broadcast %cst_158 : f32 to vector<8x119xf32>
    %146 = arith.maximumf %144, %145 : vector<8x119xf32>
    %c16 = arith.constant 16 : index
    %c0_159 = arith.constant 0 : index
    %147 = vector.load %arg10[%c16, %c0_159] : memref<32x119xf32, #tpu.memory_space<vmem>>, vector<8x119xf32>
    tpu.vector_store %arg10[%c16, %c0_159], %146 {strides = array<i32>} : memref<32x119xf32, #tpu.memory_space<vmem>>, vector<8x119xf32>,
    %c12_160 = arith.constant 12 : index
    %c0_161 = arith.constant 0 : index
    %148 = vector.load %arg0[%c12_160, %c0_161] : memref<16x128xf32, #tpu.memory_space<vmem>>, vector<4x119xf32>
    %c0_162 = arith.constant 0 : index
    %c0_163 = arith.constant 0 : index
    %c0_164 = arith.constant 0 : index
    %149 = vector.load %arg1[%c0_162, %c0_163, %c0_164] : memref<9x8x4xf32, #tpu.memory_space<vmem>>, vector<1x8x4xf32>
    %150 = vector.shape_cast %149 : vector<1x8x4xf32> to vector<8x4xf32>
    %cst_165 = arith.constant dense<0.000000e+00> : vector<8x119xf32>
    %151 = tpu.matmul %150, %148, %cst_165 {dimension_numbers = #tpu.dot_dimension_numbers<[1], [0], [0], [1], [0, 0, 1, 1], [], []>} : vector<8x4xf32>, vector<4x119xf32>, vector<8x119xf32> -> vector<8x119xf32>
    %c8_166 = arith.constant 8 : index
    %c1_167 = arith.constant 1 : index
    %152 = vector.load %arg0[%c8_166, %c1_167] : memref<16x128xf32, #tpu.memory_space<vmem>>, vector<4x119xf32>
    %c1_168 = arith.constant 1 : index
    %c0_169 = arith.constant 0 : index
    %c0_170 = arith.constant 0 : index
    %153 = vector.load %arg1[%c1_168, %c0_169, %c0_170] : memref<9x8x4xf32, #tpu.memory_space<vmem>>, vector<1x8x4xf32>
    %154 = vector.shape_cast %153 : vector<1x8x4xf32> to vector<8x4xf32>
    %cst_171 = arith.constant dense<0.000000e+00> : vector<8x119xf32>
    %155 = tpu.matmul %154, %152, %cst_171 {dimension_numbers = #tpu.dot_dimension_numbers<[1], [0], [0], [1], [0, 0, 1, 1], [], []>} : vector<8x4xf32>, vector<4x119xf32>, vector<8x119xf32> -> vector<8x119xf32>
    %156 = arith.addf %151, %155 : vector<8x119xf32>
    %c12_172 = arith.constant 12 : index
    %c1_173 = arith.constant 1 : index
    %157 = vector.load %arg0[%c12_172, %c1_173] : memref<16x128xf32, #tpu.memory_space<vmem>>, vector<4x119xf32>
    %c2_174 = arith.constant 2 : index
    %c0_175 = arith.constant 0 : index
    %c0_176 = arith.constant 0 : index
    %158 = vector.load %arg1[%c2_174, %c0_175, %c0_176] : memref<9x8x4xf32, #tpu.memory_space<vmem>>, vector<1x8x4xf32>
    %159 = vector.shape_cast %158 : vector<1x8x4xf32> to vector<8x4xf32>
    %cst_177 = arith.constant dense<0.000000e+00> : vector<8x119xf32>
    %160 = tpu.matmul %159, %157, %cst_177 {dimension_numbers = #tpu.dot_dimension_numbers<[1], [0], [0], [1], [0, 0, 1, 1], [], []>} : vector<8x4xf32>, vector<4x119xf32>, vector<8x119xf32> -> vector<8x119xf32>
    %161 = arith.addf %156, %160 : vector<8x119xf32>
    %c4_178 = arith.constant 4 : index
    %c8_179 = arith.constant 8 : index
    %162 = vector.load %arg0[%c4_178, %c8_179] : memref<16x128xf32, #tpu.memory_space<vmem>>, vector<4x119xf32>
    %c3_180 = arith.constant 3 : index
    %c0_181 = arith.constant 0 : index
    %c0_182 = arith.constant 0 : index
    %163 = vector.load %arg1[%c3_180, %c0_181, %c0_182] : memref<9x8x4xf32, #tpu.memory_space<vmem>>, vector<1x8x4xf32>
    %164 = vector.shape_cast %163 : vector<1x8x4xf32> to vector<8x4xf32>
    %cst_183 = arith.constant dense<0.000000e+00> : vector<8x119xf32>
    %165 = tpu.matmul %164, %162, %cst_183 {dimension_numbers = #tpu.dot_dimension_numbers<[1], [0], [0], [1], [0, 0, 1, 1], [], []>} : vector<8x4xf32>, vector<4x119xf32>, vector<8x119xf32> -> vector<8x119xf32>
    %166 = arith.addf %161, %165 : vector<8x119xf32>
    %c0_184 = arith.constant 0 : index
    %c9_185 = arith.constant 9 : index
    %167 = vector.load %arg0[%c0_184, %c9_185] : memref<16x128xf32, #tpu.memory_space<vmem>>, vector<4x119xf32>
    %c4_186 = arith.constant 4 : index
    %c0_187 = arith.constant 0 : index
    %c0_188 = arith.constant 0 : index
    %168 = vector.load %arg1[%c4_186, %c0_187, %c0_188] : memref<9x8x4xf32, #tpu.memory_space<vmem>>, vector<1x8x4xf32>
    %169 = vector.shape_cast %168 : vector<1x8x4xf32> to vector<8x4xf32>
    %cst_189 = arith.constant dense<0.000000e+00> : vector<8x119xf32>
    %170 = tpu.matmul %169, %167, %cst_189 {dimension_numbers = #tpu.dot_dimension_numbers<[1], [0], [0], [1], [0, 0, 1, 1], [], []>} : vector<8x4xf32>, vector<4x119xf32>, vector<8x119xf32> -> vector<8x119xf32>
    %171 = arith.addf %166, %170 : vector<8x119xf32>
    %c4_190 = arith.constant 4 : index
    %c9_191 = arith.constant 9 : index
    %172 = vector.load %arg0[%c4_190, %c9_191] : memref<16x128xf32, #tpu.memory_space<vmem>>, vector<4x119xf32>
    %c5_192 = arith.constant 5 : index
    %c0_193 = arith.constant 0 : index
    %c0_194 = arith.constant 0 : index
    %173 = vector.load %arg1[%c5_192, %c0_193, %c0_194] : memref<9x8x4xf32, #tpu.memory_space<vmem>>, vector<1x8x4xf32>
    %174 = vector.shape_cast %173 : vector<1x8x4xf32> to vector<8x4xf32>
    %cst_195 = arith.constant dense<0.000000e+00> : vector<8x119xf32>
    %175 = tpu.matmul %174, %172, %cst_195 {dimension_numbers = #tpu.dot_dimension_numbers<[1], [0], [0], [1], [0, 0, 1, 1], [], []>} : vector<8x4xf32>, vector<4x119xf32>, vector<8x119xf32> -> vector<8x119xf32>
    %176 = arith.addf %171, %175 : vector<8x119xf32>
    %c12_196 = arith.constant 12 : index
    %c8_197 = arith.constant 8 : index
    %177 = vector.load %arg0[%c12_196, %c8_197] : memref<16x128xf32, #tpu.memory_space<vmem>>, vector<4x119xf32>
    %c6_198 = arith.constant 6 : index
    %c0_199 = arith.constant 0 : index
    %c0_200 = arith.constant 0 : index
    %178 = vector.load %arg1[%c6_198, %c0_199, %c0_200] : memref<9x8x4xf32, #tpu.memory_space<vmem>>, vector<1x8x4xf32>
    %179 = vector.shape_cast %178 : vector<1x8x4xf32> to vector<8x4xf32>
    %cst_201 = arith.constant dense<0.000000e+00> : vector<8x119xf32>
    %180 = tpu.matmul %179, %177, %cst_201 {dimension_numbers = #tpu.dot_dimension_numbers<[1], [0], [0], [1], [0, 0, 1, 1], [], []>} : vector<8x4xf32>, vector<4x119xf32>, vector<8x119xf32> -> vector<8x119xf32>
    %181 = arith.addf %176, %180 : vector<8x119xf32>
    %c8_202 = arith.constant 8 : index
    %c9_203 = arith.constant 9 : index
    %182 = vector.load %arg0[%c8_202, %c9_203] : memref<16x128xf32, #tpu.memory_space<vmem>>, vector<4x119xf32>
    %c7_204 = arith.constant 7 : index
    %c0_205 = arith.constant 0 : index
    %c0_206 = arith.constant 0 : index
    %183 = vector.load %arg1[%c7_204, %c0_205, %c0_206] : memref<9x8x4xf32, #tpu.memory_space<vmem>>, vector<1x8x4xf32>
    %184 = vector.shape_cast %183 : vector<1x8x4xf32> to vector<8x4xf32>
    %cst_207 = arith.constant dense<0.000000e+00> : vector<8x119xf32>
    %185 = tpu.matmul %184, %182, %cst_207 {dimension_numbers = #tpu.dot_dimension_numbers<[1], [0], [0], [1], [0, 0, 1, 1], [], []>} : vector<8x4xf32>, vector<4x119xf32>, vector<8x119xf32> -> vector<8x119xf32>
    %186 = arith.addf %181, %185 : vector<8x119xf32>
    %c12_208 = arith.constant 12 : index
    %c9_209 = arith.constant 9 : index
    %187 = vector.load %arg0[%c12_208, %c9_209] : memref<16x128xf32, #tpu.memory_space<vmem>>, vector<4x119xf32>
    %c8_210 = arith.constant 8 : index
    %c0_211 = arith.constant 0 : index
    %c0_212 = arith.constant 0 : index
    %188 = vector.load %arg1[%c8_210, %c0_211, %c0_212] : memref<9x8x4xf32, #tpu.memory_space<vmem>>, vector<1x8x4xf32>
    %189 = vector.shape_cast %188 : vector<1x8x4xf32> to vector<8x4xf32>
    %cst_213 = arith.constant dense<0.000000e+00> : vector<8x119xf32>
    %190 = tpu.matmul %189, %187, %cst_213 {dimension_numbers = #tpu.dot_dimension_numbers<[1], [0], [0], [1], [0, 0, 1, 1], [], []>} : vector<8x4xf32>, vector<4x119xf32>, vector<8x119xf32> -> vector<8x119xf32>
    %191 = arith.addf %186, %190 : vector<8x119xf32>
    %192 = vector.broadcast %0 : vector<8x1xf32> to vector<8x119xf32>
    %193 = arith.addf %191, %192 : vector<8x119xf32>
    %cst_214 = arith.constant 0.000000e+00 : f32
    %194 = vector.broadcast %cst_214 : f32 to vector<8x119xf32>
    %195 = arith.maximumf %193, %194 : vector<8x119xf32>
    %c24 = arith.constant 24 : index
    %c0_215 = arith.constant 0 : index
    %196 = vector.load %arg10[%c24, %c0_215] : memref<32x119xf32, #tpu.memory_space<vmem>>, vector<8x119xf32>
    tpu.vector_store %arg10[%c24, %c0_215], %195 {strides = array<i32>} : memref<32x119xf32, #tpu.memory_space<vmem>>, vector<8x119xf32>,
    %c0_216 = arith.constant 0 : index
    %c0_217 = arith.constant 0 : index
    %197 = vector.load %arg4[%c0_216, %c0_217] : memref<16x1xf32, #tpu.memory_space<vmem>>, vector<16x1xf32>
    %c0_218 = arith.constant 0 : index
    %c0_219 = arith.constant 0 : index
    %198 = vector.load %arg10[%c0_218, %c0_219] : memref<32x119xf32, #tpu.memory_space<vmem>>, vector<8x110xf32>
    %c0_220 = arith.constant 0 : index
    %c0_221 = arith.constant 0 : index
    %c0_222 = arith.constant 0 : index
    %199 = vector.load %arg3[%c0_220, %c0_221, %c0_222] : memref<9x16x8xf32, #tpu.memory_space<vmem>>, vector<1x16x8xf32>
    %200 = vector.shape_cast %199 : vector<1x16x8xf32> to vector<16x8xf32>
    %cst_223 = arith.constant dense<0.000000e+00> : vector<16x110xf32>
    %201 = tpu.matmul %200, %198, %cst_223 {dimension_numbers = #tpu.dot_dimension_numbers<[1], [0], [0], [1], [0, 0, 1, 1], [], []>} : vector<16x8xf32>, vector<8x110xf32>, vector<16x110xf32> -> vector<16x110xf32>
    %c8_224 = arith.constant 8 : index
    %c0_225 = arith.constant 0 : index
    %202 = vector.load %arg10[%c8_224, %c0_225] : memref<32x119xf32, #tpu.memory_space<vmem>>, vector<8x110xf32>
    %c1_226 = arith.constant 1 : index
    %c0_227 = arith.constant 0 : index
    %c0_228 = arith.constant 0 : index
    %203 = vector.load %arg3[%c1_226, %c0_227, %c0_228] : memref<9x16x8xf32, #tpu.memory_space<vmem>>, vector<1x16x8xf32>
    %204 = vector.shape_cast %203 : vector<1x16x8xf32> to vector<16x8xf32>
    %cst_229 = arith.constant dense<0.000000e+00> : vector<16x110xf32>
    %205 = tpu.matmul %204, %202, %cst_229 {dimension_numbers = #tpu.dot_dimension_numbers<[1], [0], [0], [1], [0, 0, 1, 1], [], []>} : vector<16x8xf32>, vector<8x110xf32>, vector<16x110xf32> -> vector<16x110xf32>
    %206 = arith.addf %201, %205 : vector<16x110xf32>
    %c0_230 = arith.constant 0 : index
    %c1_231 = arith.constant 1 : index
    %207 = vector.load %arg10[%c0_230, %c1_231] : memref<32x119xf32, #tpu.memory_space<vmem>>, vector<8x110xf32>
    %c2_232 = arith.constant 2 : index
    %c0_233 = arith.constant 0 : index
    %c0_234 = arith.constant 0 : index
    %208 = vector.load %arg3[%c2_232, %c0_233, %c0_234] : memref<9x16x8xf32, #tpu.memory_space<vmem>>, vector<1x16x8xf32>
    %209 = vector.shape_cast %208 : vector<1x16x8xf32> to vector<16x8xf32>
    %cst_235 = arith.constant dense<0.000000e+00> : vector<16x110xf32>
    %210 = tpu.matmul %209, %207, %cst_235 {dimension_numbers = #tpu.dot_dimension_numbers<[1], [0], [0], [1], [0, 0, 1, 1], [], []>} : vector<16x8xf32>, vector<8x110xf32>, vector<16x110xf32> -> vector<16x110xf32>
    %211 = arith.addf %206, %210 : vector<16x110xf32>
    %c16_236 = arith.constant 16 : index
    %c0_237 = arith.constant 0 : index
    %212 = vector.load %arg10[%c16_236, %c0_237] : memref<32x119xf32, #tpu.memory_space<vmem>>, vector<8x110xf32>
    %c3_238 = arith.constant 3 : index
    %c0_239 = arith.constant 0 : index
    %c0_240 = arith.constant 0 : index
    %213 = vector.load %arg3[%c3_238, %c0_239, %c0_240] : memref<9x16x8xf32, #tpu.memory_space<vmem>>, vector<1x16x8xf32>
    %214 = vector.shape_cast %213 : vector<1x16x8xf32> to vector<16x8xf32>
    %cst_241 = arith.constant dense<0.000000e+00> : vector<16x110xf32>
    %215 = tpu.matmul %214, %212, %cst_241 {dimension_numbers = #tpu.dot_dimension_numbers<[1], [0], [0], [1], [0, 0, 1, 1], [], []>} : vector<16x8xf32>, vector<8x110xf32>, vector<16x110xf32> -> vector<16x110xf32>
    %216 = arith.addf %211, %215 : vector<16x110xf32>
    %c24_242 = arith.constant 24 : index
    %c0_243 = arith.constant 0 : index
    %217 = vector.load %arg10[%c24_242, %c0_243] : memref<32x119xf32, #tpu.memory_space<vmem>>, vector<8x110xf32>
    %c4_244 = arith.constant 4 : index
    %c0_245 = arith.constant 0 : index
    %c0_246 = arith.constant 0 : index
    %218 = vector.load %arg3[%c4_244, %c0_245, %c0_246] : memref<9x16x8xf32, #tpu.memory_space<vmem>>, vector<1x16x8xf32>
    %219 = vector.shape_cast %218 : vector<1x16x8xf32> to vector<16x8xf32>
    %cst_247 = arith.constant dense<0.000000e+00> : vector<16x110xf32>
    %220 = tpu.matmul %219, %217, %cst_247 {dimension_numbers = #tpu.dot_dimension_numbers<[1], [0], [0], [1], [0, 0, 1, 1], [], []>} : vector<16x8xf32>, vector<8x110xf32>, vector<16x110xf32> -> vector<16x110xf32>
    %221 = arith.addf %216, %220 : vector<16x110xf32>
    %c16_248 = arith.constant 16 : index
    %c1_249 = arith.constant 1 : index
    %222 = vector.load %arg10[%c16_248, %c1_249] : memref<32x119xf32, #tpu.memory_space<vmem>>, vector<8x110xf32>
    %c5_250 = arith.constant 5 : index
    %c0_251 = arith.constant 0 : index
    %c0_252 = arith.constant 0 : index
    %223 = vector.load %arg3[%c5_250, %c0_251, %c0_252] : memref<9x16x8xf32, #tpu.memory_space<vmem>>, vector<1x16x8xf32>
    %224 = vector.shape_cast %223 : vector<1x16x8xf32> to vector<16x8xf32>
    %cst_253 = arith.constant dense<0.000000e+00> : vector<16x110xf32>
    %225 = tpu.matmul %224, %222, %cst_253 {dimension_numbers = #tpu.dot_dimension_numbers<[1], [0], [0], [1], [0, 0, 1, 1], [], []>} : vector<16x8xf32>, vector<8x110xf32>, vector<16x110xf32> -> vector<16x110xf32>
    %226 = arith.addf %221, %225 : vector<16x110xf32>
    %c0_254 = arith.constant 0 : index
    %c8_255 = arith.constant 8 : index
    %227 = vector.load %arg10[%c0_254, %c8_255] : memref<32x119xf32, #tpu.memory_space<vmem>>, vector<8x110xf32>
    %c6_256 = arith.constant 6 : index
    %c0_257 = arith.constant 0 : index
    %c0_258 = arith.constant 0 : index
    %228 = vector.load %arg3[%c6_256, %c0_257, %c0_258] : memref<9x16x8xf32, #tpu.memory_space<vmem>>, vector<1x16x8xf32>
    %229 = vector.shape_cast %228 : vector<1x16x8xf32> to vector<16x8xf32>
    %cst_259 = arith.constant dense<0.000000e+00> : vector<16x110xf32>
    %230 = tpu.matmul %229, %227, %cst_259 {dimension_numbers = #tpu.dot_dimension_numbers<[1], [0], [0], [1], [0, 0, 1, 1], [], []>} : vector<16x8xf32>, vector<8x110xf32>, vector<16x110xf32> -> vector<16x110xf32>
    %231 = arith.addf %226, %230 : vector<16x110xf32>
    %c8_260 = arith.constant 8 : index
    %c8_261 = arith.constant 8 : index
    %232 = vector.load %arg10[%c8_260, %c8_261] : memref<32x119xf32, #tpu.memory_space<vmem>>, vector<8x110xf32>
    %c7_262 = arith.constant 7 : index
    %c0_263 = arith.constant 0 : index
    %c0_264 = arith.constant 0 : index
    %233 = vector.load %arg3[%c7_262, %c0_263, %c0_264] : memref<9x16x8xf32, #tpu.memory_space<vmem>>, vector<1x16x8xf32>
    %234 = vector.shape_cast %233 : vector<1x16x8xf32> to vector<16x8xf32>
    %cst_265 = arith.constant dense<0.000000e+00> : vector<16x110xf32>
    %235 = tpu.matmul %234, %232, %cst_265 {dimension_numbers = #tpu.dot_dimension_numbers<[1], [0], [0], [1], [0, 0, 1, 1], [], []>} : vector<16x8xf32>, vector<8x110xf32>, vector<16x110xf32> -> vector<16x110xf32>
    %236 = arith.addf %231, %235 : vector<16x110xf32>
    %c0_266 = arith.constant 0 : index
    %c9_267 = arith.constant 9 : index
    %237 = vector.load %arg10[%c0_266, %c9_267] : memref<32x119xf32, #tpu.memory_space<vmem>>, vector<8x110xf32>
    %c8_268 = arith.constant 8 : index
    %c0_269 = arith.constant 0 : index
    %c0_270 = arith.constant 0 : index
    %238 = vector.load %arg3[%c8_268, %c0_269, %c0_270] : memref<9x16x8xf32, #tpu.memory_space<vmem>>, vector<1x16x8xf32>
    %239 = vector.shape_cast %238 : vector<1x16x8xf32> to vector<16x8xf32>
    %cst_271 = arith.constant dense<0.000000e+00> : vector<16x110xf32>
    %240 = tpu.matmul %239, %237, %cst_271 {dimension_numbers = #tpu.dot_dimension_numbers<[1], [0], [0], [1], [0, 0, 1, 1], [], []>} : vector<16x8xf32>, vector<8x110xf32>, vector<16x110xf32> -> vector<16x110xf32>
    %241 = arith.addf %236, %240 : vector<16x110xf32>
    %242 = vector.broadcast %197 : vector<16x1xf32> to vector<16x110xf32>
    %243 = arith.addf %241, %242 : vector<16x110xf32>
    %cst_272 = arith.constant 0.000000e+00 : f32
    %244 = vector.broadcast %cst_272 : f32 to vector<16x110xf32>
    %245 = arith.maximumf %243, %244 : vector<16x110xf32>
    %c0_273 = arith.constant 0 : index
    %c0_274 = arith.constant 0 : index
    %246 = vector.load %arg5[%c0_273, %c0_274] : memref<46x1024xf32, #tpu.memory_space<vmem>>, vector<46x1024xf32>
    %c0_275 = arith.constant 0 : index
    %c0_276 = arith.constant 0 : index
    %247 = vector.load %arg6[%c0_275, %c0_276] : memref<1x64xf32, #tpu.memory_space<vmem>>, vector<1x64xf32>
    %c0_277 = arith.constant 0 : index
    %c0_278 = arith.constant 0 : index
    %248 = vector.load %arg7[%c0_277, %c0_278] : memref<64x7xf32, #tpu.memory_space<vmem>>, vector<64x7xf32>
    %c0_279 = arith.constant 0 : index
    %c0_280 = arith.constant 0 : index
    %249 = vector.load %arg8[%c0_279, %c0_280] : memref<1x7xf32, #tpu.memory_space<vmem>>, vector<1x7xf32>
    %250 = vector.extract_strided_slice %245 {offsets = [0, 0], sizes = [16, 46], strides = [1, 1]} : vector<16x110xf32> to vector<16x46xf32>
    %cst_281 = arith.constant dense<0.000000e+00> : vector<16x1024xf32>
    %251 = tpu.matmul %250, %246, %cst_281 {dimension_numbers = #tpu.dot_dimension_numbers<[1], [0], [0], [1], [0, 0, 1, 1], [], []>} : vector<16x46xf32>, vector<46x1024xf32>, vector<16x1024xf32> -> vector<16x1024xf32>
    %252 = vector.extract_strided_slice %251 {offsets = [0, 0], sizes = [1, 64], strides = [1, 1]} : vector<16x1024xf32> to vector<1x64xf32>
    %253 = vector.extract_strided_slice %251 {offsets = [1, 64], sizes = [1, 64], strides = [1, 1]} : vector<16x1024xf32> to vector<1x64xf32>
    %254 = arith.addf %252, %253 : vector<1x64xf32>
    %255 = vector.extract_strided_slice %251 {offsets = [2, 128], sizes = [1, 64], strides = [1, 1]} : vector<16x1024xf32> to vector<1x64xf32>
    %256 = arith.addf %254, %255 : vector<1x64xf32>
    %257 = vector.extract_strided_slice %251 {offsets = [3, 192], sizes = [1, 64], strides = [1, 1]} : vector<16x1024xf32> to vector<1x64xf32>
    %258 = arith.addf %256, %257 : vector<1x64xf32>
    %259 = vector.extract_strided_slice %251 {offsets = [4, 256], sizes = [1, 64], strides = [1, 1]} : vector<16x1024xf32> to vector<1x64xf32>
    %260 = arith.addf %258, %259 : vector<1x64xf32>
    %261 = vector.extract_strided_slice %251 {offsets = [5, 320], sizes = [1, 64], strides = [1, 1]} : vector<16x1024xf32> to vector<1x64xf32>
    %262 = arith.addf %260, %261 : vector<1x64xf32>
    %263 = vector.extract_strided_slice %251 {offsets = [6, 384], sizes = [1, 64], strides = [1, 1]} : vector<16x1024xf32> to vector<1x64xf32>
    %264 = arith.addf %262, %263 : vector<1x64xf32>
    %265 = vector.extract_strided_slice %251 {offsets = [7, 448], sizes = [1, 64], strides = [1, 1]} : vector<16x1024xf32> to vector<1x64xf32>
    %266 = arith.addf %264, %265 : vector<1x64xf32>
    %267 = vector.extract_strided_slice %251 {offsets = [8, 512], sizes = [1, 64], strides = [1, 1]} : vector<16x1024xf32> to vector<1x64xf32>
    %268 = arith.addf %266, %267 : vector<1x64xf32>
    %269 = vector.extract_strided_slice %251 {offsets = [9, 576], sizes = [1, 64], strides = [1, 1]} : vector<16x1024xf32> to vector<1x64xf32>
    %270 = arith.addf %268, %269 : vector<1x64xf32>
    %271 = vector.extract_strided_slice %251 {offsets = [10, 640], sizes = [1, 64], strides = [1, 1]} : vector<16x1024xf32> to vector<1x64xf32>
    %272 = arith.addf %270, %271 : vector<1x64xf32>
    %273 = vector.extract_strided_slice %251 {offsets = [11, 704], sizes = [1, 64], strides = [1, 1]} : vector<16x1024xf32> to vector<1x64xf32>
    %274 = arith.addf %272, %273 : vector<1x64xf32>
    %275 = vector.extract_strided_slice %251 {offsets = [12, 768], sizes = [1, 64], strides = [1, 1]} : vector<16x1024xf32> to vector<1x64xf32>
    %276 = arith.addf %274, %275 : vector<1x64xf32>
    %277 = vector.extract_strided_slice %251 {offsets = [13, 832], sizes = [1, 64], strides = [1, 1]} : vector<16x1024xf32> to vector<1x64xf32>
    %278 = arith.addf %276, %277 : vector<1x64xf32>
    %279 = vector.extract_strided_slice %251 {offsets = [14, 896], sizes = [1, 64], strides = [1, 1]} : vector<16x1024xf32> to vector<1x64xf32>
    %280 = arith.addf %278, %279 : vector<1x64xf32>
    %281 = vector.extract_strided_slice %251 {offsets = [15, 960], sizes = [1, 64], strides = [1, 1]} : vector<16x1024xf32> to vector<1x64xf32>
    %282 = arith.addf %280, %281 : vector<1x64xf32>
    %283 = arith.addf %282, %247 : vector<1x64xf32>
    %cst_282 = arith.constant 0.000000e+00 : f32
    %284 = vector.broadcast %cst_282 : f32 to vector<1x64xf32>
    %285 = arith.maximumf %283, %284 : vector<1x64xf32>
    %cst_283 = arith.constant dense<0.000000e+00> : vector<1x7xf32>
    %286 = tpu.matmul %285, %248, %cst_283 {dimension_numbers = #tpu.dot_dimension_numbers<[1], [0], [0], [1], [0, 0, 1, 1], [], []>} : vector<1x64xf32>, vector<64x7xf32>, vector<1x7xf32> -> vector<1x7xf32>
    %287 = arith.addf %286, %249 : vector<1x7xf32>
    %288 = vector.extract_strided_slice %287 {offsets = [0, 0], sizes = [1, 1], strides = [1, 1]} : vector<1x7xf32> to vector<1x1xf32>
    %289 = vector.extract_strided_slice %287 {offsets = [0, 1], sizes = [1, 6], strides = [1, 1]} : vector<1x7xf32> to vector<1x6xf32>
    %290 = vector.broadcast %288 : vector<1x1xf32> to vector<1x6xf32>
    %291 = arith.addf %290, %289 : vector<1x6xf32>
    %cst_284 = arith.constant dense<0.000000e+00> : vector<1xf32>
    %292 = vector.multi_reduction <add>, %289, %cst_284 [1] : vector<1x6xf32> to vector<1xf32>
    %293 = vector.shape_cast %292 : vector<1xf32> to vector<1x1xf32>
    %cst_285 = arith.constant 6.000000e+00 : f32
    %294 = vector.broadcast %cst_285 : f32 to vector<1x1xf32>
    %295 = arith.divf %293, %294 : vector<1x1xf32>
    %296 = vector.broadcast %295 : vector<1x1xf32> to vector<1x6xf32>
    %297 = arith.subf %291, %296 : vector<1x6xf32>
    %c0_286 = arith.constant 0 : index
    %c0_287 = arith.constant 0 : index
    %298 = vector.load %arg9[%c0_286, %c0_287] : memref<2x6xf32, #tpu.memory_space<vmem>>, vector<1x6xf32>
    tpu.vector_store %arg9[%c0_286, %c0_287], %297 {strides = array<i32>} : memref<2x6xf32, #tpu.memory_space<vmem>>, vector<1x6xf32>,
    %299 = vector.extract_strided_slice %245 {offsets = [0, 64], sizes = [16, 46], strides = [1, 1]} : vector<16x110xf32> to vector<16x46xf32>
    %cst_288 = arith.constant dense<0.000000e+00> : vector<16x1024xf32>
    %300 = tpu.matmul %299, %246, %cst_288 {dimension_numbers = #tpu.dot_dimension_numbers<[1], [0], [0], [1], [0, 0, 1, 1], [], []>} : vector<16x46xf32>, vector<46x1024xf32>, vector<16x1024xf32> -> vector<16x1024xf32>
    %301 = vector.extract_strided_slice %300 {offsets = [0, 0], sizes = [1, 64], strides = [1, 1]} : vector<16x1024xf32> to vector<1x64xf32>
    %302 = vector.extract_strided_slice %300 {offsets = [1, 64], sizes = [1, 64], strides = [1, 1]} : vector<16x1024xf32> to vector<1x64xf32>
    %303 = arith.addf %301, %302 : vector<1x64xf32>
    %304 = vector.extract_strided_slice %300 {offsets = [2, 128], sizes = [1, 64], strides = [1, 1]} : vector<16x1024xf32> to vector<1x64xf32>
    %305 = arith.addf %303, %304 : vector<1x64xf32>
    %306 = vector.extract_strided_slice %300 {offsets = [3, 192], sizes = [1, 64], strides = [1, 1]} : vector<16x1024xf32> to vector<1x64xf32>
    %307 = arith.addf %305, %306 : vector<1x64xf32>
    %308 = vector.extract_strided_slice %300 {offsets = [4, 256], sizes = [1, 64], strides = [1, 1]} : vector<16x1024xf32> to vector<1x64xf32>
    %309 = arith.addf %307, %308 : vector<1x64xf32>
    %310 = vector.extract_strided_slice %300 {offsets = [5, 320], sizes = [1, 64], strides = [1, 1]} : vector<16x1024xf32> to vector<1x64xf32>
    %311 = arith.addf %309, %310 : vector<1x64xf32>
    %312 = vector.extract_strided_slice %300 {offsets = [6, 384], sizes = [1, 64], strides = [1, 1]} : vector<16x1024xf32> to vector<1x64xf32>
    %313 = arith.addf %311, %312 : vector<1x64xf32>
    %314 = vector.extract_strided_slice %300 {offsets = [7, 448], sizes = [1, 64], strides = [1, 1]} : vector<16x1024xf32> to vector<1x64xf32>
    %315 = arith.addf %313, %314 : vector<1x64xf32>
    %316 = vector.extract_strided_slice %300 {offsets = [8, 512], sizes = [1, 64], strides = [1, 1]} : vector<16x1024xf32> to vector<1x64xf32>
    %317 = arith.addf %315, %316 : vector<1x64xf32>
    %318 = vector.extract_strided_slice %300 {offsets = [9, 576], sizes = [1, 64], strides = [1, 1]} : vector<16x1024xf32> to vector<1x64xf32>
    %319 = arith.addf %317, %318 : vector<1x64xf32>
    %320 = vector.extract_strided_slice %300 {offsets = [10, 640], sizes = [1, 64], strides = [1, 1]} : vector<16x1024xf32> to vector<1x64xf32>
    %321 = arith.addf %319, %320 : vector<1x64xf32>
    %322 = vector.extract_strided_slice %300 {offsets = [11, 704], sizes = [1, 64], strides = [1, 1]} : vector<16x1024xf32> to vector<1x64xf32>
    %323 = arith.addf %321, %322 : vector<1x64xf32>
    %324 = vector.extract_strided_slice %300 {offsets = [12, 768], sizes = [1, 64], strides = [1, 1]} : vector<16x1024xf32> to vector<1x64xf32>
    %325 = arith.addf %323, %324 : vector<1x64xf32>
    %326 = vector.extract_strided_slice %300 {offsets = [13, 832], sizes = [1, 64], strides = [1, 1]} : vector<16x1024xf32> to vector<1x64xf32>
    %327 = arith.addf %325, %326 : vector<1x64xf32>
    %328 = vector.extract_strided_slice %300 {offsets = [14, 896], sizes = [1, 64], strides = [1, 1]} : vector<16x1024xf32> to vector<1x64xf32>
    %329 = arith.addf %327, %328 : vector<1x64xf32>
    %330 = vector.extract_strided_slice %300 {offsets = [15, 960], sizes = [1, 64], strides = [1, 1]} : vector<16x1024xf32> to vector<1x64xf32>
    %331 = arith.addf %329, %330 : vector<1x64xf32>
    %332 = arith.addf %331, %247 : vector<1x64xf32>
    %cst_289 = arith.constant 0.000000e+00 : f32
    %333 = vector.broadcast %cst_289 : f32 to vector<1x64xf32>
    %334 = arith.maximumf %332, %333 : vector<1x64xf32>
    %cst_290 = arith.constant dense<0.000000e+00> : vector<1x7xf32>
    %335 = tpu.matmul %334, %248, %cst_290 {dimension_numbers = #tpu.dot_dimension_numbers<[1], [0], [0], [1], [0, 0, 1, 1], [], []>} : vector<1x64xf32>, vector<64x7xf32>, vector<1x7xf32> -> vector<1x7xf32>
    %336 = arith.addf %335, %249 : vector<1x7xf32>
    %337 = vector.extract_strided_slice %336 {offsets = [0, 0], sizes = [1, 1], strides = [1, 1]} : vector<1x7xf32> to vector<1x1xf32>
    %338 = vector.extract_strided_slice %336 {offsets = [0, 1], sizes = [1, 6], strides = [1, 1]} : vector<1x7xf32> to vector<1x6xf32>
    %339 = vector.broadcast %337 : vector<1x1xf32> to vector<1x6xf32>
    %340 = arith.addf %339, %338 : vector<1x6xf32>
    %cst_291 = arith.constant dense<0.000000e+00> : vector<1xf32>
    %341 = vector.multi_reduction <add>, %338, %cst_291 [1] : vector<1x6xf32> to vector<1xf32>
    %342 = vector.shape_cast %341 : vector<1xf32> to vector<1x1xf32>
    %cst_292 = arith.constant 6.000000e+00 : f32
    %343 = vector.broadcast %cst_292 : f32 to vector<1x1xf32>
    %344 = arith.divf %342, %343 : vector<1x1xf32>
    %345 = vector.broadcast %344 : vector<1x1xf32> to vector<1x6xf32>
    %346 = arith.subf %340, %345 : vector<1x6xf32>
    %c1_293 = arith.constant 1 : index
    %c0_294 = arith.constant 0 : index
    %347 = vector.load %arg9[%c1_293, %c0_294] : memref<2x6xf32, #tpu.memory_space<vmem>>, vector<1x6xf32>
    tpu.vector_store %arg9[%c1_293, %c0_294], %346 {strides = array<i32>} : memref<2x6xf32, #tpu.memory_space<vmem>>, vector<1x6xf32>,
    return
  }
}

</mosaic_0001>

<bundles_post_ra>
// kernel: dqn_forward.1
= control target key start
LH: loop header
LB: loop body
LE: loop exit
PB: predicated region body
PF: predicated region fallthrough
CT: control target
= control target key end

     0   :  { %s5497_s11 = smov 127   ;;  %s5498_s12 = smov 120   ;;  %v5499_v3 = vmov 0.0   ;;  %vm43_vm0 = vcmask 1043456   ;;  %vm5500_vm1 = vmmov 0   ;;  %vm39_vm2 = vcmask 31744   ;;  %s6443_s0 = inlined_call_operand.vmem [shape: f32[16,128], index: 0, kind: input, shape index: {}]   ;;  %s6444_s1 = inlined_call_operand.vmem [shape: f32[9,8,4], index: 1, kind: input, shape index: {}]   ;;  %s6445_s2 = inlined_call_operand.vmem [shape: f32[8,1], index: 2, kind: input, shape index: {}]   ;;  %s6446_s3 = inlined_call_operand.vmem [shape: f32[9,16,8], index: 3, kind: input, shape index: {}]   ;;  %s6447_s4 = inlined_call_operand.vmem [shape: f32[16,1], index: 4, kind: input, shape index: {}]   ;;  %s6448_s5 = inlined_call_operand.vmem [shape: f32[46,1024], index: 5, kind: input, shape index: {}]   ;;  %s6449_s6 = inlined_call_operand.vmem [shape: f32[1,64], index: 6, kind: input, shape index: {}]   ;;  %s6450_s7 = inlined_call_operand.vmem [shape: f32[64,7], index: 7, kind: input, shape index: {}]   ;;  %s6451_s8 = inlined_call_operand.vmem [shape: f32[1,7], index: 8, kind: input, shape index: {}]   ;;  %s6452_s9 = inlined_call_operand.hbm [shape: f32[2,6], index: 9, kind: output, shape index: {}]  }
   0x1   :  { %v34_v0 = vld [vmem:[%s6443_s0] sm:$0xf]  ;;  %v273_v1 = vld [vmem:[%s6443_s0 + $0x8] sm:$0xf]  ;;  %v36_v2 = vld [vmem:[%s6443_s0 + $0x4] sm:$0xf]  ;;  %5046 = vmatprep.subr.mxu1 %v5499_v3  ;;  %5056 = vmatprep.subr.mxu0 %v5499_v3 }
   0x2   :  { %195 = vrot.lane.b32.xlu0 %v34_v0, %s5497_s11  ;;  %515 = vrot.lane.b32.xlu1 %v34_v0, %s5498_s12  ;;  %v764_v4 = vld [vmem:[%s6443_s0] sm:$0xf]  ;;  %v5581_v5 = vld [vmem:[%s6444_s1 + $0x8] sm:$0xff]  ;;  %s5501_s23 = smov 119  }
   0x3   :  { %5047 = vmatpush3.msk.msra.mxu1 %vm43_vm0, %v36_v2  ;;  %5048 = vmatprep.mubr.msk.f32.mxu1 %vm5500_vm1, %v5499_v3  ;;  %v5592_v6 = vld [vmem:[%s6444_s1] sm:$0xff] }
   0x4   :  { %5049 = vmatmul.mubr.msk.f32.vlgmr.msra.gmra.mrb[0].mxu1 %vm39_vm2, %v5581_v5  ;;  %5051 = vmatprep.subr.mxu1 %v5499_v3 }
   0x5   :  { %5052 = vmatpush3.msk.msra.mxu1 %vm43_vm0, %v34_v0  ;;  %5053 = vmatprep.mubr.msk.f32.mxu1 %vm5500_vm1, %v5499_v3 }
   0x6   :  { %435 = vrot.lane.b32.xlu0 %v273_v1, %s5497_s11  ;;  %595 = vrot.lane.b32.xlu1 %v36_v2, %s5498_s12 }
   0xa   :  { %767 = vrot.lane.b32.xlu1 %v764_v4, %s5497_s11  ;;  %675 = vrot.lane.b32.xlu0 %v34_v0, %s5501_s23 }
   0xb   :  { %14 = vsyncpa [#allocation4], 0  ;;  %v5599_v7 = vld [vmem:[%s6443_s0 + $0x4] sm:$0xf]  ;;  %v1078_v8 = vld [vmem:[%s6443_s0 + $0x8] sm:$0xf]  ;;  %5061 = vmatprep.subr.mxu1 %v5499_v3  ;;  %5058 = vmatprep.mubr.msk.f32.mxu0 %vm5500_vm1, %v5499_v3 }
   0xc   :  { %5054 = vmatmul.mubr.msk.f32.vlgmr.msra.gmra.mrb[2].mxu1 %vm39_vm2, %v5592_v6  ;;  %v5615_v9 = vld [vmem:[%s6444_s1 + $0x18] sm:$0xff]  ;;  %v5623_v10 = vld [vmem:[%s6443_s0 + $0xc] sm:$0xf]  ;;  %v5640_v11 = vld [vmem:[%s6443_s0 + $0x8] sm:$0xf]  ;;  %v5502_v20 = vmov 0  }
   0xd   :  { %5062 = vmatpush3.msk.msra.mxu1 %vm43_vm0, %v273_v1  ;;  %5063 = vmatprep.mubr.msk.f32.mxu1 %vm5500_vm1, %v5499_v3  ;;  %v1713_v12 = vld [vmem:[%s6443_s0] sm:$0xf]  ;;  %v1794_v13 = vld [vmem:[%s6443_s0 + $0x4] sm:$0xf]  ;;  %v5656_v14 = vld [vmem:[%s6443_s0 + $0xc] sm:$0xf] }
   0xe   :  { %921 = vrot.lane.b32.xlu0 %v5599_v7, %s5497_s11  ;;  %1081 = vrot.lane.b32.xlu1 %v1078_v8, %s5497_s11  ;;  %v2196_v15 = vld [vmem:[%s6443_s0 + $0x8] sm:$0xf]  ;;  %v5671_v16 = vld [vmem:[%s6443_s0 + $0xc] sm:$0xf]  ;;  %vm2921_vm3 = vcmask 64512   ;;  %vm760_vm4 = vcmask 973824  }
   0xf   :  { %5071 = vmatprep.subr.mxu1 %v5499_v3  ;;  %v2431_v17 = vld [vmem:[%s6443_s0 + $0x4] sm:$0xf]  ;;  %v2512_v18 = vld [vmem:[%s6443_s0] sm:$0xf]  ;;  %5471 = vset.pattern.permute.xlu1 %v5502_v20  ;;  %v5695_v21 = vld [vmem:[%s6444_s1 + $0x10] sm:$0xff]  ;;  %vm3785_vm5 = vcmask 1045504  }
  0x10   :  { %5064 = vmatmul.mubr.msk.f32.vlgmr.msra.gmra.mrb[4].mxu1 %vm39_vm2, %v5615_v9  ;;  %v33_v19 = vld [vmem:[%s6445_s2] sm:$0xff]  ;;  %5472 = vset.pattern.permute.xlu0 %v5502_v20  ;;  %v353_v24 = vld [vmem:[%s6443_s0 + $0xc] sm:$0xf]  ;;  %v5728_v29 = vld [vmem:[%s6444_s1 + $0x30] sm:$0xff]  ;;  %vm5503_vm6 = vmmov 1   ;;  %vm3778_vm8 = vcmask 375808  }
  0x11   :  { %5073 = vmatprep.mubr.msk.f32.mxu1 %vm5500_vm1, %v5499_v3  ;;  %v5710_v25 = vld [vmem:[%s6444_s1 + $0x20] sm:$0xff]  ;;  %v5715_v26 = vld [vmem:[%s6444_s1 + $0x28] sm:$0xff]  ;;  %v5733_v30 = vld [vmem:[%s6444_s1 + $0x38] sm:$0xff]  ;;  %vm4179_vm9 = vcmask 523264   ;;  %vm4262_vm10 = vcmask 40960  }
  0x12   :  { %1239 = vrot.lane.b32.xlu1 %v5599_v7, %s5498_s12  ;;  %1160 = vrot.lane.b32.xlu0 %v5623_v10, %s5497_s11  ;;  %v5750_v33 = vld [vmem:[%s6444_s1 + $0x40] sm:$0xff]  ;;  %v4861_v62 = vld [vmem:[%s6446_s3 + $0x10] sm:$0xff]  ;;  %vm6106_vm7 = vmpackc.low %vm3785_vm5, %vm5503_vm6 }
  0x16   :  { %1397 = vrot.lane.b32.xlu1 %v5599_v7, %s5501_s23  ;;  %1318 = vrot.lane.b32.xlu0 %v764_v4, %s5501_s23 }
  0x1a   :  { %1635 = vrot.lane.b32.xlu0 %v5640_v11, %s5497_s11  ;;  %1716 = vrot.lane.b32.xlu1 %v1713_v12, %s5498_s12 }
  0x1e   :  { %1797 = vrot.lane.b32.xlu0 %v1794_v13, %s5498_s12  ;;  %1876 = vrot.lane.b32.xlu1 %v1713_v12, %s5501_s23 }
  0x22   :  { %1955 = vrot.lane.b32.xlu0 %v5640_v11, %s5498_s12  ;;  %2034 = vrot.lane.b32.xlu1 %v5656_v14, %s5498_s12 }
  0x26   :  { %2113 = vrot.lane.b32.xlu0 %v5640_v11, %s5501_s23  ;;  %2199 = vrot.lane.b32.xlu1 %v2196_v15, %s5497_s11 }
  0x2a   :  { %2353 = vrot.lane.b32.xlu0 %v5671_v16, %s5497_s11  ;;  %2434 = vrot.lane.b32.xlu1 %v2431_v17, %s5498_s12 }
  0x2e   :  { %2515 = vrot.lane.b32.xlu0 %v2512_v18, %s5501_s23  ;;  %2594 = vrot.lane.b32.xlu1 %v2431_v17, %s5501_s23 }
  0x32   :  { %2673 = vrot.lane.b32.xlu0 %v5671_v16, %s5498_s12  ;;  %2752 = vrot.lane.b32.xlu1 %v2196_v15, %s5501_s23 }
  0x36   :  { %2831 = vrot.lane.b32.xlu0 %v5671_v16, %s5501_s23  ;;  %755 = vperm.xlu1 %5471, %v33_v19  }
  0x74   :  { %v196_v22 = vpop.permute.xlu0 %195  ;;  %v516_v23 = vpop.permute.xlu1 %515 }
  0x75   :  { %5057 = vmatpush3.msk.msra.mxu0 %vm43_vm0, %v196_v22 }
  0x76   :  { %5059 = vmatmul.mubr.msk.f32.vlgmr.msra.gmra.mrb[0].mxu0 %vm39_vm2, %v5695_v21  ;;  %5066 = vmatprep.subr.mxu0 %v5499_v3 }
  0x77   :  { %5067 = vmatpush3.msk.msra.mxu0 %vm43_vm0, %v353_v24  ;;  %5068 = vmatprep.mubr.msk.f32.mxu0 %vm5500_vm1, %v5499_v3 }
  0x78   :  { %v436_v27 = vpop.permute.xlu0 %435  ;;  %5076 = vmatprep.subr.mxu0 %v5499_v3  ;;  %v596_v28 = vpop.permute.xlu1 %595 }
  0x79   :  { %5072 = vmatpush3.msk.msra.mxu1 %vm43_vm0, %v436_v27 }
  0x7a   :  { %5069 = vmatmul.mubr.msk.f32.vlgmr.msra.gmra.mrb[2].mxu0 %vm39_vm2, %v5710_v25  ;;  %5074 = vmatmul.mubr.msk.f32.vlgmr.msra.gmra.mrb[6].mxu1 %vm39_vm2, %v5715_v26 }
  0x7b   :  { %5077 = vmatpush3.msk.msra.mxu0 %vm43_vm0, %v516_v23  ;;  %5081 = vmatprep.subr.mxu1 %v5499_v3 }
  0x7c   :  { %5078 = vmatprep.mubr.msk.f32.mxu0 %vm5500_vm1, %v5499_v3  ;;  %5082 = vmatpush3.msk.msra.mxu1 %vm43_vm0, %v596_v28  ;;  %v768_v31 = vpop.permute.xlu1 %767  ;;  %v676_v32 = vpop.permute.xlu0 %675 }
  0x7d   :  { %5083 = vmatprep.mubr.msk.f32.mxu1 %vm5500_vm1, %v5499_v3  ;;  %5086 = vmatprep.subr.mxu0 %v5499_v3 }
  0x7e   :  { %5079 = vmatmul.mubr.msk.f32.vlgmr.msra.gmra.mrb[4].mxu0 %vm39_vm2, %v5728_v29  ;;  %5084 = vmatmul.mubr.msk.f32.vlgmr.msra.gmra.mrb[8].mxu1 %vm39_vm2, %v5733_v30 }
  0x7f   :  { %5091 = vmatprep.subr.mxu1 %v5499_v3  ;;  %5087 = vmatpush3.msk.msra.mxu0 %vm43_vm0, %v676_v32 }
  0x80   :  { %5088 = vmatprep.mubr.msk.f32.mxu0 %vm5500_vm1, %v5499_v3  ;;  %5092 = vmatpush3.msk.msra.mxu1 %vm43_vm0, %v768_v31  ;;  %v922_v34 = vpop.permute.xlu0 %921  ;;  %v1082_v35 = vpop.permute.xlu1 %1081 }
  0x81   :  { %5093 = vmatprep.mubr.msk.f32.mxu1 %vm5500_vm1, %v5499_v3  ;;  %5096 = vmatprep.subr.mxu0 %v5499_v3 }
  0x82   :  { %5089 = vmatmul.mubr.msk.f32.vlgmr.msra.gmra.mrb[6].mxu0 %vm39_vm2, %v5750_v33  ;;  %5094 = vmatmul.mubr.msk.f32.vlgmr.msra.gmra.mrb[10].mxu1 %vm39_vm2, %v5581_v5 }
  0x83   :  { %5101 = vmatprep.subr.mxu1 %v5499_v3  ;;  %5097 = vmatpush3.msk.msra.mxu0 %vm43_vm0, %v5599_v7 }
  0x84   :  { %5098 = vmatprep.mubr.msk.f32.mxu0 %vm5500_vm1, %v5499_v3  ;;  %5102 = vmatpush3.msk.msra.mxu1 %vm43_vm0, %v922_v34  ;;  %v1240_v36 = vpop.permute.xlu1 %1239  ;;  %v1161_v37 = vpop.permute.xlu0 %1160 }
  0x85   :  { %5103 = vmatprep.mubr.msk.f32.mxu1 %vm5500_vm1, %v5499_v3  ;;  %5106 = vmatprep.subr.mxu0 %v5499_v3 }
  0x86   :  { %5099 = vmatmul.mubr.msk.f32.vlgmr.msra.gmra.mrb[8].mxu0 %vm39_vm2, %v5592_v6  ;;  %5104 = vmatmul.mubr.msk.f32.vlgmr.msra.gmra.mrb[12].mxu1 %vm39_vm2, %v5695_v21 }
  0x87   :  { %5111 = vmatprep.subr.mxu1 %v5499_v3  ;;  %5107 = vmatpush3.msk.msra.mxu0 %vm43_vm0, %v5623_v10 }
  0x88   :  { %5108 = vmatprep.mubr.msk.f32.mxu0 %vm5500_vm1, %v5499_v3  ;;  %5112 = vmatpush3.msk.msra.mxu1 %vm43_vm0, %v1082_v35  ;;  %v1319_v38 = vpop.permute.xlu0 %1318  ;;  %v1398_v39 = vpop.permute.xlu1 %1397 }
  0x89   :  { %5113 = vmatprep.mubr.msk.f32.mxu1 %vm5500_vm1, %v5499_v3  ;;  %5116 = vmatprep.subr.mxu0 %v5499_v3 }
  0x8a   :  { %5109 = vmatmul.mubr.msk.f32.vlgmr.msra.gmra.mrb[10].mxu0 %vm39_vm2, %v5615_v9  ;;  %5114 = vmatmul.mubr.msk.f32.vlgmr.msra.gmra.mrb[14].mxu1 %vm39_vm2, %v5710_v25 }
  0x8b   :  { %5121 = vmatprep.subr.mxu1 %v5499_v3  ;;  %5117 = vmatpush3.msk.msra.mxu0 %vm43_vm0, %v1161_v37 }
  0x8c   :  { %5118 = vmatprep.mubr.msk.f32.mxu0 %vm5500_vm1, %v5499_v3  ;;  %5122 = vmatpush3.msk.msra.mxu1 %vm43_vm0, %v1240_v36  ;;  %v1636_v40 = vpop.permute.xlu0 %1635  ;;  %v1717_v41 = vpop.permute.xlu1 %1716 }
  0x8d   :  { %5123 = vmatprep.mubr.msk.f32.mxu1 %vm5500_vm1, %v5499_v3  ;;  %5126 = vmatprep.subr.mxu0 %v5499_v3 }
  0x8e   :  { %5119 = vmatmul.mubr.msk.f32.vlgmr.msra.gmra.mrb[12].mxu0 %vm39_vm2, %v5715_v26  ;;  %5124 = vmatmul.mubr.msk.f32.vlgmr.msra.gmra.mrb[16].mxu1 %vm39_vm2, %v5728_v29 }
  0x8f   :  { %5131 = vmatprep.subr.mxu1 %v5499_v3  ;;  %5127 = vmatpush3.msk.msra.mxu0 %vm43_vm0, %v1319_v38 }
  0x90   :  { %5128 = vmatprep.mubr.msk.f32.mxu0 %vm5500_vm1, %v5499_v3  ;;  %5132 = vmatpush3.msk.msra.mxu1 %vm43_vm0, %v1398_v39  ;;  %v1798_v42 = vpop.permute.xlu0 %1797  ;;  %v1877_v43 = vpop.permute.xlu1 %1876 }
  0x91   :  { %5133 = vmatprep.mubr.msk.f32.mxu1 %vm5500_vm1, %v5499_v3  ;;  %5136 = vmatprep.subr.mxu0 %v5499_v3 }
  0x92   :  { %5129 = vmatmul.mubr.msk.f32.vlgmr.msra.gmra.mrb[14].mxu0 %vm39_vm2, %v5733_v30  ;;  %5134 = vmatmul.mubr.msk.f32.vlgmr.msra.gmra.mrb[18].mxu1 %vm39_vm2, %v5750_v33 }
  0x93   :  { %5141 = vmatprep.subr.mxu1 %v5499_v3  ;;  %5137 = vmatpush3.msk.msra.mxu0 %vm43_vm0, %v5656_v14 }
  0x94   :  { %5138 = vmatprep.mubr.msk.f32.mxu0 %vm5500_vm1, %v5499_v3  ;;  %5142 = vmatpush3.msk.msra.mxu1 %vm43_vm0, %v5640_v11  ;;  %v1956_v44 = vpop.permute.xlu0 %1955  ;;  %v2035_v45 = vpop.permute.xlu1 %2034 }
  0x95   :  { %5143 = vmatprep.mubr.msk.f32.mxu1 %vm5500_vm1, %v5499_v3  ;;  %5146 = vmatprep.subr.mxu0 %v5499_v3 }
  0x96   :  { %5139 = vmatmul.mubr.msk.f32.vlgmr.msra.gmra.mrb[16].mxu0 %vm39_vm2, %v5581_v5  ;;  %5144 = vmatmul.mubr.msk.f32.vlgmr.msra.gmra.mrb[20].mxu1 %vm39_vm2, %v5592_v6 }
  0x97   :  { %5147 = vmatpush3.msk.msra.mxu0 %vm43_vm0, %v1636_v40  ;;  %5148 = vmatprep.mubr.msk.f32.mxu0 %vm5500_vm1, %v5499_v3 }
  0x98   :  { %5151 = vmatprep.subr.mxu1 %v5499_v3  ;;  %5153 = vmatprep.mubr.msk.f32.mxu1 %vm5500_vm1, %v5499_v3  ;;  %v2114_v46 = vpop.permute.xlu0 %2113  ;;  %v2200_v47 = vpop.permute.xlu1 %2199 }
  0x99   :  { %5152 = vmatpush3.msk.msra.mxu1 %vm43_vm0, %v1717_v41  ;;  %5156 = vmatprep.subr.mxu0 %v5499_v3 }
  0x9a   :  { %5149 = vmatmul.mubr.msk.f32.vlgmr.msra.gmra.mrb[18].mxu0 %vm39_vm2, %v5695_v21  ;;  %5154 = vmatmul.mubr.msk.f32.vlgmr.msra.gmra.mrb[22].mxu1 %vm39_vm2, %v5615_v9 }
  0x9b   :  { %5157 = vmatpush3.msk.msra.mxu0 %vm43_vm0, %v1798_v42  ;;  %5158 = vmatprep.mubr.msk.f32.mxu0 %vm5500_vm1, %v5499_v3 }
  0x9c   :  { %5161 = vmatprep.subr.mxu1 %v5499_v3  ;;  %5163 = vmatprep.mubr.msk.f32.mxu1 %vm5500_vm1, %v5499_v3  ;;  %v2354_v48 = vpop.permute.xlu0 %2353  ;;  %v2435_v49 = vpop.permute.xlu1 %2434 }
  0x9d   :  { %5162 = vmatpush3.msk.msra.mxu1 %vm43_vm0, %v1877_v43  ;;  %5166 = vmatprep.subr.mxu0 %v5499_v3 }
  0x9e   :  { %5159 = vmatmul.mubr.msk.f32.vlgmr.msra.gmra.mrb[20].mxu0 %vm39_vm2, %v5710_v25  ;;  %5164 = vmatmul.mubr.msk.f32.vlgmr.msra.gmra.mrb[24].mxu1 %vm39_vm2, %v5715_v26 }
  0x9f   :  { %5167 = vmatpush3.msk.msra.mxu0 %vm43_vm0, %v1956_v44  ;;  %5168 = vmatprep.mubr.msk.f32.mxu0 %vm5500_vm1, %v5499_v3 }
  0xa0   :  { %5171 = vmatprep.subr.mxu1 %v5499_v3  ;;  %5173 = vmatprep.mubr.msk.f32.mxu1 %vm5500_vm1, %v5499_v3  ;;  %v2516_v50 = vpop.permute.xlu0 %2515  ;;  %v2595_v51 = vpop.permute.xlu1 %2594 }
  0xa1   :  { %5172 = vmatpush3.msk.msra.mxu1 %vm43_vm0, %v2035_v45  ;;  %5176 = vmatprep.subr.mxu0 %v5499_v3 }
  0xa2   :  { %5169 = vmatmul.mubr.msk.f32.vlgmr.msra.gmra.mrb[22].mxu0 %vm39_vm2, %v5728_v29  ;;  %5174 = vmatmul.mubr.msk.f32.vlgmr.msra.gmra.mrb[26].mxu1 %vm39_vm2, %v5733_v30 }
  0xa3   :  { %5177 = vmatpush3.msk.msra.mxu0 %vm43_vm0, %v2114_v46  ;;  %5178 = vmatprep.mubr.msk.f32.mxu0 %vm5500_vm1, %v5499_v3 }
  0xa4   :  { %5181 = vmatprep.subr.mxu1 %v5499_v3  ;;  %5183 = vmatprep.mubr.msk.f32.mxu1 %vm5500_vm1, %v5499_v3  ;;  %v2674_v52 = vpop.permute.xlu0 %2673  ;;  %v2753_v53 = vpop.permute.xlu1 %2752 }
  0xa5   :  { %5182 = vmatpush3.msk.msra.mxu1 %vm43_vm0, %v2200_v47  ;;  %5186 = vmatprep.subr.mxu0 %v5499_v3 }
  0xa6   :  { %5179 = vmatmul.mubr.msk.f32.vlgmr.msra.gmra.mrb[24].mxu0 %vm39_vm2, %v5750_v33  ;;  %5184 = vmatmul.mubr.msk.f32.vlgmr.msra.gmra.mrb[28].mxu1 %vm39_vm2, %v5581_v5 }
  0xa7   :  { %5187 = vmatpush3.msk.msra.mxu0 %vm43_vm0, %v5671_v16  ;;  %5188 = vmatprep.mubr.msk.f32.mxu0 %vm5500_vm1, %v5499_v3 }
  0xa8   :  { %5191 = vmatprep.subr.mxu1 %v5499_v3  ;;  %5193 = vmatprep.mubr.msk.f32.mxu1 %vm5500_vm1, %v5499_v3  ;;  %v2832_v54 = vpop.permute.xlu0 %2831 }
  0xa9   :  { %5192 = vmatpush3.msk.msra.mxu1 %vm43_vm0, %v2354_v48  ;;  %5196 = vmatprep.subr.mxu0 %v5499_v3 }
  0xaa   :  { %5189 = vmatmul.mubr.msk.f32.vlgmr.msra.gmra.mrb[26].mxu0 %vm39_vm2, %v5592_v6  ;;  %5194 = vmatmul.mubr.msk.f32.vlgmr.msra.gmra.mrb[30].mxu1 %vm39_vm2, %v5695_v21 }
  0xab   :  { %5197 = vmatpush3.msk.msra.mxu0 %vm43_vm0, %v2435_v49  ;;  %5198 = vmatprep.mubr.msk.f32.mxu0 %vm5500_vm1, %v5499_v3 }
  0xac   :  { %5201 = vmatprep.subr.mxu1 %v5499_v3  ;;  %5203 = vmatprep.mubr.msk.f32.mxu1 %vm5500_vm1, %v5499_v3 }
  0xad   :  { %5202 = vmatpush3.msk.msra.mxu1 %vm43_vm0, %v2516_v50  ;;  %5206 = vmatprep.subr.mxu0 %v5499_v3 }
  0xae   :  { %5199 = vmatmul.mubr.msk.f32.vlgmr.msra.gmra.mrb[28].mxu0 %vm39_vm2, %v5615_v9  ;;  %5204 = vmatmul.mubr.msk.f32.vlgmr.msra.gmra.mrb[32].mxu1 %vm39_vm2, %v5710_v25 }
  0xaf   :  { %5207 = vmatpush3.msk.msra.mxu0 %vm43_vm0, %v2595_v51  ;;  %5208 = vmatprep.mubr.msk.f32.mxu0 %vm5500_vm1, %v5499_v3 }
  0xb0   :  { %5211 = vmatprep.subr.mxu1 %v5499_v3  ;;  %5213 = vmatprep.mubr.msk.f32.mxu1 %vm5500_vm1, %v5499_v3 }
  0xb1   :  { %5212 = vmatpush3.msk.msra.mxu1 %vm43_vm0, %v2674_v52  ;;  %5216 = vmatprep.subr.mxu0 %v5499_v3 }
  0xb2   :  { %5209 = vmatmul.mubr.msk.f32.vlgmr.msra.gmra.mrb[30].mxu0 %vm39_vm2, %v5715_v26  ;;  %5214 = vmatmul.mubr.msk.f32.vlgmr.msra.gmra.mrb[34].mxu1 %vm39_vm2, %v5728_v29 }
  0xb3   :  { %5217 = vmatpush3.msk.msra.mxu0 %vm43_vm0, %v2753_v53  ;;  %5218 = vmatprep.mubr.msk.f32.mxu0 %vm5500_vm1, %v5499_v3 }
  0xb4   :  { %5221 = vmatprep.subr.mxu1 %v5499_v3  ;;  %5223 = vmatprep.mubr.msk.f32.mxu1 %vm5500_vm1, %v5499_v3 }
  0xb5   :  { %5222 = vmatpush3.msk.msra.mxu1 %vm43_vm0, %v2832_v54  ;;  %v5927_v16 = vpop.permute.xlu1 %755 }
  0xb6   :  { %5219 = vmatmul.mubr.msk.f32.vlgmr.msra.gmra.mrb[32].mxu0 %vm39_vm2, %v5733_v30  ;;  %5224 = vmatmul.mubr.msk.f32.vlgmr.msra.gmra.mrb[36].mxu1 %vm39_vm2, %v5750_v33 }
  0xb7   :  { %3874 = vmatprep.mubr.f32.mxu1 %v5499_v3  ;;  %5228 = vmatprep.mubr.msk.f32.mxu0 %vm2921_vm3, %v4861_v62 }
  0xd7   :  { %v113_v55 = vpop.f32.mrb[0].mxu1 }
  0xd8   :  { %v5050_v56 = vpop.f32.mrb[1].mxu1 }
  0xdf   :  { %v189_v57 = vpop.f32.mrb[2].mxu1 }
  0xe0   :  { %v190_v58 = vadd.f32 %v189_v57, %v113_v55  ;;  %v5055_v59 = vpop.f32.mrb[3].mxu1 }
  0xe3   :  { %v348_v60 = vpop.f32.mrb[4].mxu1 }
  0xe4   :  { %v5065_v61 = vpop.f32.mrb[5].mxu1 }
 0x149   :  { %v268_v63 = vpop.f32.mrb[0].mxu0 }
 0x14a   :  { %v272_v0 = vadd.f32 %v268_v63, %v190_v58  ;;  %v5060_v1 = vpop.f32.mrb[1].mxu0 }
 0x14c   :  { %v352_v2 = vadd.f32 %v348_v60, %v272_v0 }
 0x14d   :  { %v428_v4 = vpop.f32.mrb[2].mxu0  ;;  %v508_v5 = vpop.f32.mrb[6].mxu1 }
 0x14e   :  { %v432_v6 = vadd.f32 %v428_v4, %v352_v2  ;;  %v5070_v7 = vpop.f32.mrb[3].mxu0  ;;  %v5075_v8 = vpop.f32.mrb[7].mxu1 }
 0x14f   :  { %v4862_v8 = vld [vmem:[%s6446_s3 + $0x18] sm:$0xff] }
 0x150   :  { %v512_v9 = vadd.f32 %v508_v5, %v432_v6 }
 0x151   :  { %v588_v10 = vpop.f32.mrb[4].mxu0  ;;  %v668_v11 = vpop.f32.mrb[8].mxu1 }
 0x152   :  { %v592_v12 = vadd.f32 %v588_v10, %v512_v9  ;;  %v5080_v13 = vpop.f32.mrb[5].mxu0  ;;  %v5085_v14 = vpop.f32.mrb[9].mxu1 }
 0x154   :  { %v672_v15 = vadd.f32 %v668_v11, %v592_v12  ;;  %v2915_v12 = vld [vmem:[%s6446_s3] sm:$0xff] }
 0x155   :  { %v748_v17 = vpop.f32.mrb[6].mxu0  ;;  %v840_v18 = vpop.f32.mrb[10].mxu1 }
 0x156   :  { %v752_v19 = vadd.f32 %v748_v17, %v672_v15  ;;  %v5090_v20 = vpop.f32.mrb[7].mxu0  ;;  %v5095_v21 = vpop.f32.mrb[11].mxu1 }
 0x158   :  { %v758_v22 = vadd.f32 %v5927_v16, %v752_v19 }
 0x159   :  { %v916_v23 = vpop.f32.mrb[8].mxu0  ;;  %v994_v24 = vpop.f32.mrb[12].mxu1 }
 0x15a   :  { %v759_v25 = vmax.f32 %v758_v22, 0.0  ;;  %v917_v26 = vadd.f32 %v916_v23, %v840_v18  ;;  %v5100_v27 = vpop.f32.mrb[9].mxu0  ;;  %v5105_v28 = vpop.f32.mrb[13].mxu1  ;;  %v2916_v23 = vld [vmem:[%s6446_s3 + $0x8] sm:$0xff] }
 0x15b   :  { %v4867_v28 = vld [vmem:[%s6446_s3 + $0x20] sm:$0xff] }
 0x15c   :  { %761 = vst.msk [vmem:[#allocation2] sm:$0xff] %vm760_vm4, %v759_v25  ;;  %v998_v29 = vadd.f32 %v994_v24, %v917_v26 }
 0x15d   :  { %v1073_v30 = vpop.f32.mrb[10].mxu0  ;;  %v1154_v31 = vpop.f32.mrb[14].mxu1 }
 0x15e   :  { %v1077_v32 = vadd.f32 %v1073_v30, %v998_v29  ;;  %v5110_v33 = vpop.f32.mrb[11].mxu0  ;;  %v5115_v34 = vpop.f32.mrb[15].mxu1 }
 0x160   :  { %v1158_v35 = vadd.f32 %v1154_v31, %v1077_v32 }
 0x161   :  { %v1233_v36 = vpop.f32.mrb[12].mxu0  ;;  %v1312_v37 = vpop.f32.mrb[16].mxu1 }
 0x162   :  { %v1237_v38 = vadd.f32 %v1233_v36, %v1158_v35  ;;  %v5120_v39 = vpop.f32.mrb[13].mxu0  ;;  %v5125_v40 = vpop.f32.mrb[17].mxu1 }
 0x163   :  { %v2914_v41 = vld [vmem:[#allocation2] sm:$0xff] }
 0x164   :  { %v1316_v42 = vadd.f32 %v1312_v37, %v1237_v38  ;;  %3088 = vrot.lane.b32.xlu0 %v2914_v41, %s5497_s11 }
 0x165   :  { %v1391_v43 = vpop.f32.mrb[14].mxu0  ;;  %v1470_v44 = vpop.f32.mrb[18].mxu1 }
 0x166   :  { %v1395_v45 = vadd.f32 %v1391_v43, %v1316_v42  ;;  %v5130_v46 = vpop.f32.mrb[15].mxu0  ;;  %v5135_v47 = vpop.f32.mrb[19].mxu1 }
 0x168   :  { %v1474_v48 = vadd.f32 %v1470_v44, %v1395_v45  ;;  %3441 = vrot.lane.b32.xlu0 %v2914_v41, %s5498_s12 }
 0x169   :  { %v1554_v49 = vpop.f32.mrb[16].mxu0  ;;  %v1630_v50 = vpop.f32.mrb[20].mxu1 }
 0x16a   :  { %v1475_v51 = vadd.f32 %v1474_v48, %v5927_v16  ;;  %v1631_v52 = vadd.f32 %v1630_v50, %v1554_v49  ;;  %v5140_v53 = vpop.f32.mrb[17].mxu0  ;;  %v5145_v54 = vpop.f32.mrb[21].mxu1  ;;  %v2912_v49 = vld [vmem:[%s6447_s4] sm:$0xff] }
 0x16b   :  { %v3721_v53 = vld [vmem:[%s6448_s5 + $0x8] sm:$0xff] }
 0x16c   :  { %v1476_v55 = vmax.f32 %v1475_v51, 0.0  ;;  %3620 = vrot.lane.b32.xlu0 %v2914_v41, %s5501_s23  ;;  %v3729_v54 = vld [vmem:[%s6448_s5 + $0x48] sm:$0xff] }
 0x16d   :  { %v1708_v56 = vpop.f32.mrb[18].mxu0  ;;  %v1789_v57 = vpop.f32.mrb[22].mxu1 }
 0x16e   :  { %1477 = vst.msk [vmem:[#allocation2 + $0x8] sm:$0xff] %vm760_vm4, %v1476_v55  ;;  %v1712_v58 = vadd.f32 %v1708_v56, %v1631_v52  ;;  %v5150_v59 = vpop.f32.mrb[19].mxu0  ;;  %v5155_v60 = vpop.f32.mrb[23].mxu1  ;;  %v2913_v52 = vld [vmem:[%s6447_s4 + $0x8] sm:$0xff]  ;;  %v5970_v55 = vpack.c.bf16 %v3729_v54, %v3721_v53  ;;  %v3728_v56 = vld [vmem:[%s6448_s5 + $0x40] sm:$0xff] }
 0x16f   :  { %v3745_v59 = vld [vmem:[%s6448_s5 + $0xc8] sm:$0xff]  ;;  %v3736_v60 = vld [vmem:[%s6448_s5 + $0x80] sm:$0xff] }
 0x170   :  { %v1793_v61 = vadd.f32 %v1789_v57, %v1712_v58  ;;  %3713 = vperm.xlu0 %5472, %v2913_v52   ;;  %5310 = vmatprep.subr.bf16.mxu1 %v5970_v55  ;;  %v3737_v58 = vld [vmem:[%s6448_s5 + $0x88] sm:$0xff]  ;;  %v3730_v52 = vld [vmem:[%s6448_s5 + $0x50] sm:$0xff] }
 0x171   :  { %v1870_v62 = vpop.f32.mrb[20].mxu0  ;;  %v1949_v63 = vpop.f32.mrb[24].mxu1 }
 0x172   :  { %v1874_v0 = vadd.f32 %v1870_v62, %v1793_v61  ;;  %v5160_v1 = vpop.f32.mrb[21].mxu0  ;;  %v5165_v2 = vpop.f32.mrb[25].mxu1  ;;  %v5991_v61 = vpack.c.bf16 %v3745_v59, %v3737_v58  ;;  %v3744_v62 = vld [vmem:[%s6448_s5 + $0xc0] sm:$0xff] }
 0x173   :  { %v4868_v1 = vld [vmem:[%s6446_s3 + $0x28] sm:$0xff]  ;;  %v4871_v2 = vld [vmem:[%s6446_s3 + $0x30] sm:$0xff] }
 0x174   :  { %v1953_v4 = vadd.f32 %v1949_v63, %v1874_v0  ;;  %v5996_v63 = vpack.c.bf16 %v3744_v62, %v3736_v60 }
 0x175   :  { %v2028_v5 = vpop.f32.mrb[22].mxu0  ;;  %v2107_v6 = vpop.f32.mrb[26].mxu1  ;;  %v2917_v7 = vld [vmem:[#allocation2 + $0x8] sm:$0xff] }
 0x176   :  { %v2032_v9 = vadd.f32 %v2028_v5, %v1953_v4  ;;  %v5170_v10 = vpop.f32.mrb[23].mxu0  ;;  %5226 = vmatprep.subr.mxu0 %v2917_v7  ;;  %v5175_v11 = vpop.f32.mrb[27].mxu1  ;;  %v4872_v5 = vld [vmem:[%s6446_s3 + $0x38] sm:$0xff] }
 0x177   :  { %5227 = vmatpush3.msra.mxu0 %v2917_v7  ;;  %v4880_v10 = vld [vmem:[%s6446_s3 + $0x58] sm:$0xff]  ;;  %v4883_v11 = vld [vmem:[%s6446_s3 + $0x60] sm:$0xff] }
 0x178   :  { %v2111_v13 = vadd.f32 %v2107_v6, %v2032_v9  ;;  %5231 = vmatprep.subr.mxu0 %v2914_v41  ;;  %5229 = vmatmul.mubr.msk.f32.vlgmr.msra.gmra.mrb[34].mxu0 %vm2921_vm3, %v4862_v8  ;;  %v4875_v6 = vld [vmem:[%s6446_s3 + $0x40] sm:$0xff]  ;;  %v4879_v8 = vld [vmem:[%s6446_s3 + $0x50] sm:$0xff] }
 0x179   :  { %v2186_v14 = vpop.f32.mrb[24].mxu0  ;;  %5232 = vmatpush3.msra.mxu0 %v2914_v41  ;;  %v2272_v15 = vpop.f32.mrb[28].mxu1  ;;  %5233 = vmatprep.mubr.msk.f32.mxu0 %vm2921_vm3, %v2915_v12 }
 0x17a   :  { %v2190_v17 = vadd.f32 %v2186_v14, %v2111_v13  ;;  %v5180_v18 = vpop.f32.mrb[25].mxu0  ;;  %v5185_v19 = vpop.f32.mrb[29].mxu1  ;;  %v4884_v14 = vld [vmem:[%s6446_s3 + $0x68] sm:$0xff] }
 0x17b   :  { %v3727_v18 = vld [vmem:[%s6448_s5 + $0x38] sm:$0xff] }
 0x17c   :  { %v2191_v20 = vadd.f32 %v2190_v17, %v5927_v16  ;;  %v3735_v19 = vld [vmem:[%s6448_s5 + $0x78] sm:$0xff] }
 0x17d   :  { %v2348_v21 = vpop.f32.mrb[26].mxu0  ;;  %v2426_v22 = vpop.f32.mrb[30].mxu1 }
 0x17e   :  { %v2192_v24 = vmax.f32 %v2191_v20, 0.0  ;;  %v2349_v25 = vadd.f32 %v2348_v21, %v2272_v15  ;;  %v5190_v26 = vpop.f32.mrb[27].mxu0  ;;  %v5195_v27 = vpop.f32.mrb[31].mxu1  ;;  %v4887_v15 = vld [vmem:[%s6446_s3 + $0x70] sm:$0xff]  ;;  %v4888_v20 = vld [vmem:[%s6446_s3 + $0x78] sm:$0xff]  ;;  %v4891_v21 = vld [vmem:[%s6446_s3 + $0x80] sm:$0xff] }
 0x17f   :  { %v3751_v26 = vld [vmem:[%s6448_s5 + $0xf8] sm:$0xff]  ;;  %v4892_v27 = vld [vmem:[%s6446_s3 + $0x88] sm:$0xff] }
 0x180   :  { %2193 = vst.msk [vmem:[#allocation2 + $0x10] sm:$0xff] %vm760_vm4, %v2192_v24  ;;  %v2430_v29 = vadd.f32 %v2426_v22, %v2349_v25  ;;  %5234 = vmatmul.mubr.msk.f32.vlgmr.msra.gmra.mrb[34].mxu0 %vm2921_vm3, %v2916_v23  ;;  %v6052_v22 = vpack.c.bf16 %v3735_v19, %v3727_v18  ;;  %v3726_v23 = vld [vmem:[%s6448_s5 + $0x30] sm:$0xff]  ;;  %v3743_v25 = vld [vmem:[%s6448_s5 + $0xb8] sm:$0xff]  ;;  %v3740_v19 = vld [vmem:[%s6448_s5 + $0xa0] sm:$0xff] }
 0x181   :  { %v2507_v30 = vpop.f32.mrb[28].mxu0  ;;  %v2588_v31 = vpop.f32.mrb[32].mxu1  ;;  %5238 = vmatprep.mubr.msk.f32.mxu0 %vm2921_vm3, %v4867_v28  ;;  %v3734_v24 = vld [vmem:[%s6448_s5 + $0x70] sm:$0xff] }
 0x182   :  { %v2511_v32 = vadd.f32 %v2507_v30, %v2430_v29  ;;  %v5200_v33 = vpop.f32.mrb[29].mxu0  ;;  %v5205_v34 = vpop.f32.mrb[33].mxu1  ;;  %v6072_v28 = vpack.c.bf16 %v3734_v24, %v3726_v23  ;;  %v6074_v29 = vpack.c.bf16 %v3751_v26, %v3743_v25  ;;  %v3742_v30 = vld [vmem:[%s6448_s5 + $0xb0] sm:$0xff]  ;;  %v3756_v25 = vld [vmem:[%s6448_s5 + $0x120] sm:$0xff] }
 0x183   :  { %v3753_v33 = vld [vmem:[%s6448_s5 + $0x108] sm:$0xff]  ;;  %v3764_v26 = vld [vmem:[%s6448_s5 + $0x160] sm:$0x3f] }
 0x184   :  { %v2592_v35 = vadd.f32 %v2588_v31, %v2511_v32  ;;  %v3750_v31 = vld [vmem:[%s6448_s5 + $0xf0] sm:$0xff]  ;;  %v3761_v34 = vld [vmem:[%s6448_s5 + $0x148] sm:$0x3f] }
 0x185   :  { %v2667_v36 = vpop.f32.mrb[30].mxu0  ;;  %v2746_v37 = vpop.f32.mrb[34].mxu1  ;;  %v6084_v32 = vpack.c.bf16 %v3750_v31, %v3742_v30 }
 0x186   :  { %v2671_v38 = vadd.f32 %v2667_v36, %v2592_v35  ;;  %v5210_v39 = vpop.f32.mrb[31].mxu0  ;;  %v5215_v40 = vpop.f32.mrb[35].mxu1  ;;  %v6095_v35 = vpack.c.bf16 %v3761_v34, %v3753_v33  ;;  %v3752_v36 = vld [vmem:[%s6448_s5 + $0x100] sm:$0xff] }
 0x187   :  { %v3174_v41 = vld [vmem:[#allocation2 + $0x10] sm:$0xff] }
 0x188   :  { %v2750_v42 = vadd.f32 %v2746_v37, %v2671_v38  ;;  %3352 = vrot.lane.b32.xlu1 %v3174_v41, %s5497_s11  ;;  %v3760_v37 = vld [vmem:[%s6448_s5 + $0x140] sm:$0x3f]  ;;  %v3759_v38 = vld [vmem:[%s6448_s5 + $0x138] sm:$0xff] }
 0x189   :  { %v2825_v43 = vpop.f32.mrb[32].mxu0  ;;  %v2904_v44 = vpop.f32.mrb[36].mxu1  ;;  %v6110_v40 = vpack.c.bf16 %v3760_v37, %v3752_v36 }
 0x18a   :  { %v2829_v45 = vadd.f32 %v2825_v43, %v2750_v42  ;;  %v5220_v46 = vpop.f32.mrb[33].mxu0  ;;  %v5225_v47 = vpop.f32.mrb[37].mxu1  ;;  %v3758_v42 = vld [vmem:[%s6448_s5 + $0x130] sm:$0xff] }
 0x18b   :  { %v3723_v46 = vld [vmem:[%s6448_s5 + $0x18] sm:$0xff] }
 0x18c   :  { %v2908_v48 = vadd.f32 %v2904_v44, %v2829_v45  ;;  %3531 = vrot.lane.b32.xlu1 %v2917_v7, %s5498_s12  ;;  %v4876_v7 = vld [vmem:[%s6446_s3 + $0x48] sm:$0xff]  ;;  %v3766_v44 = vld [vmem:[%s6448_s5 + $0x170] sm:$0x3f]  ;;  %v3731_v47 = vld [vmem:[%s6448_s5 + $0x58] sm:$0xff] }
 0x18d   :  { %v6129_v45 = vpack.c.bf16 %v3766_v44, %v3758_v42 }
 0x18e   :  { %v2909_v50 = vadd.f32 %v2908_v48, %v5927_v16  ;;  %v3720_v16 = vld [vmem:[%s6448_s5] sm:$0xff]  ;;  %v6140_v48 = vpack.c.bf16 %v3731_v47, %v3723_v46 }
 0x18f   :  { %v5978_v57 = vpack.c.bf16 %v3728_v56, %v3720_v16  ;;  %v3739_v16 = vld [vmem:[%s6448_s5 + $0x98] sm:$0xff] }
 0x190   :  { %v2910_v51 = vmax.f32 %v2909_v50, 0.0  ;;  %3708 = vperm.xlu1 %5471, %v2912_v49  }
 0x191   :  { %5312 = vmatpush1.bf16.msra.mxu1 %v5978_v57 }
 0x192   :  { %2911 = vst.msk [vmem:[#allocation2 + $0x18] sm:$0xff] %vm760_vm4, %v2910_v51  ;;  %5314 = vmatprep.subr.bf16.mxu1 %v5991_v61  ;;  %v3722_v51 = vld [vmem:[%s6448_s5 + $0x10] sm:$0xff] }
 0x193   :  { %v6159_v58 = vpack.c.bf16 %v3730_v52, %v3722_v51  ;;  %v3769_v51 = vld [vmem:[%s6450_s7] sm:$0xff]  ;;  %v3770_v52 = vld [vmem:[%s6450_s7 + $0x8] sm:$0xff] }
 0x195   :  { %5316 = vmatpush1.bf16.msra.mxu1 %v5996_v63 }
 0x196   :  { %5319 = vmatprep.subr.msk.bf16.mxu1 %vm6106_vm7, %v6095_v35 }
 0x199   :  { %v3261_v4 = vld [vmem:[#allocation2 + $0x18] sm:$0xff]  ;;  %5322 = vmatpush1.bf16.msk.msra.mxu1 %vm6106_vm7, %v6110_v40 }
 0x19a   :  { %5324 = vmatprep.subr.bf16.mxu1 %v6140_v48 }
 0x1d6   :  { %v3089_v0 = vpop.permute.xlu0 %3088 }
 0x1d7   :  { %5236 = vmatprep.subr.mxu0 %v3089_v0 }
 0x1d8   :  { %5237 = vmatpush3.msra.mxu0 %v3089_v0  ;;  %v3738_v0 = vld [vmem:[%s6448_s5 + $0x90] sm:$0xff] }
 0x1d9   :  { %5239 = vmatmul.mubr.msk.f32.vlgmr.msra.gmra.mrb[34].mxu0 %vm2921_vm3, %v4868_v1  ;;  %5241 = vmatprep.subr.mxu0 %v3174_v41  ;;  %v3746_v1 = vld [vmem:[%s6448_s5 + $0xd0] sm:$0xff] }
 0x1da   :  { %5242 = vmatpush3.msra.mxu0 %v3174_v41  ;;  %5243 = vmatprep.mubr.msk.f32.mxu0 %vm2921_vm3, %v4871_v2  ;;  %v3442_v12 = vpop.permute.xlu0 %3441  ;;  %v3767_v41 = vld [vmem:[%s6448_s5 + $0x178] sm:$0x3f] }
 0x1db   :  { %5246 = vmatprep.subr.mxu0 %v3261_v4  ;;  %v6121_v43 = vpack.c.bf16 %v3767_v41, %v3759_v38  ;;  %v3755_v2 = vld [vmem:[%s6448_s5 + $0x118] sm:$0xff] }
 0x1de   :  { %v3621_v17 = vpop.permute.xlu0 %3620 }
 0x1e1   :  { %5244 = vmatmul.mubr.msk.f32.vlgmr.msra.gmra.mrb[34].mxu0 %vm2921_vm3, %v4872_v5  ;;  %v6183_v5 = vpack.c.bf16 %v3746_v1, %v3738_v0  ;;  %v3773_v1 = vld [vmem:[%s6450_s7 + $0x20] sm:$0xff] }
 0x1e2   :  { %5247 = vmatpush3.msra.mxu0 %v3261_v4  ;;  %5248 = vmatprep.mubr.msk.f32.mxu0 %vm2921_vm3, %v4875_v6  ;;  %v3763_v4 = vld [vmem:[%s6448_s5 + $0x158] sm:$0x3f] }
 0x1e9   :  { %5249 = vmatmul.mubr.msk.f32.vlgmr.msra.gmra.mrb[34].mxu0 %vm2921_vm3, %v4876_v7  ;;  %v6189_v7 = vpack.c.bf16 %v3763_v4, %v3755_v2  ;;  %v3774_v2 = vld [vmem:[%s6450_s7 + $0x28] sm:$0xff] }
 0x1ea   :  { %5253 = vmatprep.mubr.msk.f32.mxu0 %vm2921_vm3, %v4879_v8  ;;  %v3754_v8 = vld [vmem:[%s6448_s5 + $0x110] sm:$0xff]  ;;  %v6324_v4 = vpack.c.bf16 %v3774_v2, %v3773_v1 }
 0x1ef   :  { %v3714_v53 = vpop.permute.xlu0 %3713 }
 0x1fa   :  { %v3353_v9 = vpop.permute.xlu1 %3352 }
 0x1fb   :  { %5251 = vmatprep.subr.mxu0 %v3353_v9 }
 0x1fc   :  { %5252 = vmatpush3.msra.mxu0 %v3353_v9  ;;  %v3762_v9 = vld [vmem:[%s6448_s5 + $0x150] sm:$0x3f] }
 0x1fd   :  { %5254 = vmatmul.mubr.msk.f32.vlgmr.msra.gmra.mrb[34].mxu0 %vm2921_vm3, %v4880_v10  ;;  %5256 = vmatprep.subr.mxu0 %v3442_v12  ;;  %v3725_v10 = vld [vmem:[%s6448_s5 + $0x28] sm:$0xff] }
 0x1fe   :  { %v3532_v13 = vpop.permute.xlu1 %3531  ;;  %5257 = vmatpush3.msra.mxu0 %v3442_v12  ;;  %5258 = vmatprep.mubr.msk.f32.mxu0 %vm2921_vm3, %v4883_v11  ;;  %v3733_v11 = vld [vmem:[%s6448_s5 + $0x68] sm:$0xff]  ;;  %v6209_v12 = vpack.c.bf16 %v3762_v9, %v3754_v8 }
 0x1ff   :  { %5261 = vmatprep.subr.mxu0 %v3532_v13 }
 0x205   :  { %5259 = vmatmul.mubr.msk.f32.vlgmr.msra.gmra.mrb[34].mxu0 %vm2921_vm3, %v4884_v14  ;;  %v3732_v14 = vld [vmem:[%s6448_s5 + $0x60] sm:$0xff] }
 0x206   :  { %5262 = vmatpush3.msra.mxu0 %v3532_v13  ;;  %5263 = vmatprep.mubr.msk.f32.mxu0 %vm2921_vm3, %v4887_v15  ;;  %v5337_v13 = vpack.c.bf16 %v3733_v11, %v3725_v10  ;;  %v3741_v15 = vld [vmem:[%s6448_s5 + $0xa8] sm:$0xff] }
 0x207   :  { %5266 = vmatprep.subr.mxu0 %v3621_v17 }
 0x20d   :  { %5264 = vmatmul.mubr.msk.f32.vlgmr.msra.gmra.mrb[34].mxu0 %vm2921_vm3, %v4888_v20  ;;  %v3757_v20 = vld [vmem:[%s6448_s5 + $0x128] sm:$0xff] }
 0x20e   :  { %5267 = vmatpush3.msra.mxu0 %v3621_v17  ;;  %5268 = vmatprep.mubr.msk.f32.mxu0 %vm2921_vm3, %v4891_v21  ;;  %v3749_v17 = vld [vmem:[%s6448_s5 + $0xe8] sm:$0xff] }
 0x20f   :  { %5352 = vmatprep.subr.bf16.mxu0 %v6052_v22  ;;  %v3709_v49 = vpop.permute.xlu1 %3708  ;;  %v6238_v18 = vpack.c.bf16 %v3749_v17, %v3741_v15  ;;  %v3765_v21 = vld [vmem:[%s6448_s5 + $0x168] sm:$0x3f] }
 0x210   :  { %v6262_v24 = vpack.c.bf16 %v3765_v21, %v3757_v20 }
 0x215   :  { %5269 = vmatmul.mubr.msk.f32.vlgmr.msra.gmra.mrb[34].mxu0 %vm2921_vm3, %v4892_v27  ;;  %v6273_v27 = vpack.c.bf16 %v3764_v26, %v3756_v25 }
 0x216   :  { %5354 = vmatpush1.bf16.msra.mxu0 %v6072_v28  ;;  %4099 = vmatprep.mubr.f32.mxu0 %v5499_v3 }
 0x217   :  { %5356 = vmatprep.subr.bf16.mxu0 %v6074_v29 }
 0x21a   :  { %5358 = vmatpush1.bf16.msra.mxu0 %v6084_v32 }
 0x21b   :  { %5361 = vmatprep.subr.msk.bf16.mxu0 %vm6106_vm7, %v6121_v43 }
 0x21e   :  { %5364 = vmatpush1.bf16.msk.msra.mxu0 %vm6106_vm7, %v6129_v45 }
 0x21f   :  { %5378 = vmatprep.subr.bf16.mxu0 %v5970_v55  ;;  %v3747_v55 = vld [vmem:[%s6448_s5 + $0xd8] sm:$0xff] }
 0x220   :  { %v6163_v62 = vpack.c.bf16 %v3747_v55, %v3739_v16  ;;  %v3771_v16 = vld [vmem:[%s6450_s7 + $0x10] sm:$0xff]  ;;  %v3772_v55 = vld [vmem:[%s6450_s7 + $0x18] sm:$0xff] }
 0x2e8   :  { %v5270_v50 = vpop.f32.mrb[34].mxu0 }
 0x2e9   :  { %v3695_v54 = vpop.f32.mrb[35].mxu0  ;;  %v3717_v59 = vadd.f32 %v5270_v50, %v3714_v53  ;;  %v6303_v53 = vpack.c.bf16 %v3770_v52, %v3769_v51 }
 0x2ea   :  { %v3716_v56 = vadd.f32 %v3709_v49, %v3695_v54  ;;  %v5505_v54 = vmov 0.0|0.0  }
 0x2eb   :  { %v6185_v6 = vmax.f32 %v3717_v59, 0.0 }
 0x2ec   :  { %v6161_v60 = vmax.f32 %v3716_v56, 0.0  ;;  %v6314_v56 = vpack.c.bf16 %v3772_v55, %v3771_v16 }
 0x2ee   :  { %4897 = vmatmul.mubr.msk.f32.vlgmr.msra.gmra.mrb[38].mxu1 %vm3778_vm8, %v6161_v60  ;;  %4909 = vmatmul.mubr.msk.f32.vlgmr.msra.gmra.mrb[36].mxu0 %vm3778_vm8, %v6161_v60 }
 0x2ef   :  { %5326 = vmatpush1.bf16.msra.mxu1 %v6159_v58  ;;  %3880 = vmatprep.mubr.f32.mxu1 %v5499_v3 }
 0x2f0   :  { %5328 = vmatprep.subr.bf16.mxu1 %v6163_v62  ;;  %4103 = vmatprep.mubr.f32.mxu0 %v5499_v3 }
 0x2f1   :  { %5380 = vmatpush1.bf16.msra.mxu0 %v5978_v57  ;;  %v3724_v57 = vld [vmem:[%s6448_s5 + $0x20] sm:$0xff] }
 0x2f2   :  { %4898 = vmatmul.mubr.msk.f32.gmra.mrb[40].mxu1 %vm3778_vm8, %v6185_v6  ;;  %4910 = vmatmul.mubr.msk.f32.gmra.mrb[38].mxu0 %vm3778_vm8, %v6185_v6 }
 0x2f3   :  { %5330 = vmatpush1.bf16.msra.mxu1 %v6183_v5  ;;  %3949 = vmatprep.mubr.f32.mxu1 %v5499_v3 }
 0x2f4   :  { %5333 = vmatprep.subr.msk.bf16.mxu1 %vm6106_vm7, %v6189_v7  ;;  %5382 = vmatprep.subr.bf16.mxu0 %v5991_v61  ;;  %v6236_v61 = vpack.c.bf16 %v3732_v14, %v3724_v57  ;;  %v3776_v57 = vld [vmem:[%s6450_s7 + $0x38] sm:$0xff] }
 0x2f5   :  { %5384 = vmatpush1.bf16.msra.mxu0 %v5996_v63  ;;  %4346 = vmatprep.mubr.f32.mxu0 %v5499_v3  ;;  %v3748_v63 = vld [vmem:[%s6448_s5 + $0xe0] sm:$0xff]  ;;  %s5504_s5 = smov 64  }
 0x2f6   :  { %5387 = vmatprep.subr.msk.bf16.mxu0 %vm6106_vm7, %v6095_v35  ;;  %v6259_v23 = vpack.c.bf16 %v3748_v63, %v3740_v19 }
 0x2f7   :  { %5336 = vmatpush1.bf16.msk.msra.mxu1 %vm6106_vm7, %v6209_v12 }
 0x2f8   :  { %5338 = vmatprep.subr.bf16.mxu1 %v5337_v13 }
 0x2f9   :  { %5390 = vmatpush1.bf16.msk.msra.mxu0 %vm6106_vm7, %v6110_v40 }
 0x2fa   :  { %4901 = vmatmul.mubr.msk.f32.vlgmr.msra.gmra.mrb[42].mxu1 %vm3778_vm8, %v6161_v60  ;;  %5406 = vmatprep.subr.bf16.mxu0 %v5337_v13  ;;  %v3775_v13 = vld [vmem:[%s6450_s7 + $0x30] sm:$0xff] }
 0x2fb   :  { %5340 = vmatpush1.bf16.msra.mxu1 %v6236_v61  ;;  %3955 = vmatprep.mubr.f32.mxu1 %v5499_v3  ;;  %v6335_v14 = vpack.c.bf16 %v3776_v57, %v3775_v13  ;;  %v3777_v13 = vld [vmem:[%s6451_s8] sm:$0x1]  ;;  %s5506_s8 = smov [#allocation3]  }
 0x2fc   :  { %5342 = vmatprep.subr.bf16.mxu1 %v6238_v18  ;;  %s4749_s30 = sshll.u32 %s5506_s8, 4  ;;  %s4750_s30 = int_to_ptr.vmem [resolvable:$true] %s4749_s30 }
 0x2fd   :  { %s5473_s10 = scalar_lea.vmem %s4750_s30, 32  ;;  %p5478_p1 = scmp.lt.s32.totalorder %s4750_s30, %s4750_s30 }
 0x2fe   :  { %4902 = vmatmul.mubr.msk.f32.gmra.mrb[44].mxu1 %vm3778_vm8, %v6185_v6  ;;  %p5474_p0 = scmp.ne.s32.totalorder %s4750_s30, %s5473_s10  ;;  %p5479_p2 = scmp.lt.s32.totalorder %s5473_s10, %s5473_s10 }
 0x2ff   :  { %5344 = vmatpush1.bf16.msra.mxu1 %v6259_v23  ;;  %4024 = vmatprep.mubr.f32.mxu1 %v5499_v3 }
 0x300   :  { %5347 = vmatprep.subr.msk.bf16.mxu1 %vm6106_vm7, %v6262_v24  ;;  %p5480_p3 = por %p5479_p2, %p5478_p1 }
 0x302   :  { %p5481_p4 = pnand %p5480_p3, %p5474_p0 }
 0x303   :  { %5350 = vmatpush1.bf16.msk.msra.mxu1 %vm6106_vm7, %v6273_v27 }
 0x304   :  { %5365 = vmatprep.subr.bf16.mxu1 %v5505_v54 }
 0x306   :  { %4905 = vmatmul.mubr.msk.f32.vlgmr.msra.gmra.mrb[46].mxu1 %vm3778_vm8, %v6161_v60 }
 0x307   :  { %4028 = vmatprep.mubr.f32.mxu1 %v5499_v3  ;;  %5367 = vmatpush3.bf16.msra.mxu1 %v6303_v53 }
 0x308   :  { %5368 = vmatprep.subr.bf16.mxu1 %v5505_v54 }
 0x30a   :  { %4906 = vmatmul.mubr.msk.f32.gmra.mrb[48].mxu1 %vm3778_vm8, %v6185_v6 }
 0x30b   :  { %5287 = vmatprep.mubr.msk.f32.mxu1 %vm5500_vm1, %v5499_v3  ;;  %5370 = vmatpush3.bf16.msra.mxu1 %v6314_v56 }
 0x30c   :  { %5371 = vmatprep.subr.bf16.mxu1 %v5505_v54 }
 0x30f   :  { %5373 = vmatpush3.bf16.msra.mxu1 %v6324_v4 }
 0x310   :  { %5374 = vmatprep.subr.bf16.mxu1 %v5505_v54 }
 0x313   :  { %5376 = vmatpush3.bf16.msra.mxu1 %v6335_v14 }
 0x314   :  { %5392 = vmatprep.subr.bf16.mxu1 %v6140_v48 }
 0x3c1   :  { %v3876_v30 = vpop.f32.mrb[38].mxu1  ;;  %v4101_v31 = vpop.f32.mrb[36].mxu0 }
 0x3c2   :  { %v4111_v33 = vrot.slane %v3876_v30, 1  ;;  %v3878_v34 = vpop.f32.mrb[39].mxu1  ;;  %v4102_v35 = vpop.f32.mrb[37].mxu0 }
 0x3c3   :  { %v4120_v38 = vrot.slane %v3878_v34, 3  ;;  %v4117_v63 = vrot.slane %v3878_v34, 2 }
 0x3c4   :  { %4112 = vrot.lane.b32.xlu1 %v4111_v33, %s5504_s5 }
 0x3c5   :  { %v3882_v36 = vpop.f32.mrb[40].mxu1  ;;  %v6290_v37 = vpop.f32.mrb[38].mxu0 }
 0x3c6   :  { %v3883_v40 = vpop.f32.mrb[41].mxu1  ;;  %v6292_v41 = vpop.f32.mrb[39].mxu0  ;;  %v4163_v15 = vrot.slane %v6290_v37, 5 }
 0x3c7   :  { %v4172_v17 = vrot.slane %v6292_v41, 7 }
 0x3c8   :  { %4121 = vrot.lane.b32.xlu1 %v4120_v38, %s5504_s5 }
 0x3cd   :  { %v3951_v42 = vpop.f32.mrb[42].mxu1 }
 0x3ce   :  { %v4129_v44 = vrot.slane %v3951_v42, 5  ;;  %v3953_v46 = vpop.f32.mrb[43].mxu1  ;;  %v4126_v26 = vrot.slane %v3951_v42, 4 }
 0x3cf   :  { %v4138_v47 = vrot.slane %v3953_v46, 7  ;;  %v4135_v48 = vrot.slane %v3953_v46, 6 }
 0x3d0   :  { %4130 = vrot.lane.b32.xlu0 %v4129_v44, %s5504_s5 }
 0x3d1   :  { %4139 = vrot.lane.b32.xlu1 %v4138_v47, %s5504_s5  ;;  %v3957_v49 = vpop.f32.mrb[44].mxu1 }
 0x3d2   :  { %v3958_v50 = vpop.f32.mrb[45].mxu1 }
 0x3d9   :  { %v4026_v59 = vpop.f32.mrb[46].mxu1 }
 0x3da   :  { %v4027_v0 = vpop.f32.mrb[47].mxu1  ;;  %v4169_v59 = vrot.slane %v6292_v41, 6 }
 0x3dd   :  { %v4030_v8 = vpop.f32.mrb[48].mxu1 }
 0x3de   :  { %v4145_v9 = vrot.slane %v4030_v8, 1  ;;  %v4032_v10 = vpop.f32.mrb[49].mxu1 }
 0x3df   :  { %v4154_v11 = vrot.slane %v4032_v10, 3 }
 0x3e0   :  { %4146 = vrot.lane.b32.xlu0 %v4145_v9, %s5504_s5 }
 0x3e1   :  { %4155 = vrot.lane.b32.xlu1 %v4154_v11, %s5504_s5 }
 0x3e4   :  { %4164 = vrot.lane.b32.xlu0 %v4163_v15, %s5504_s5 }
 0x3e5   :  { %4173 = vrot.lane.b32.xlu1 %v4172_v17, %s5504_s5 }
 0x3e8   :  { %4274 = vrot.lane.b32.xlu0 %v6161_v60, %s5504_s5  ;;  %v4151_v60 = vrot.slane %v4032_v10, 2 }
 0x3e9   :  { %4276 = vrot.lane.b32.xlu1 %v6185_v6, %s5504_s5 }
 0x436   :  { %v4113_v19 = vpop.permute.xlu1 %4112 }
 0x437   :  { %v4115_v20 = vadd.f32 %v4113_v19, %v3876_v30  ;;  %v4160_v30 = vrot.slane %v6290_v37, 4  ;;  %v6357_v37 = vld [vmem:[%s6449_s6] sm:$0x1] }
 0x439   :  { %v4119_v21 = vadd.f32 %v4117_v63, %v4115_v20 }
 0x43a   :  { %v4122_v25 = vpop.permute.xlu1 %4121 }
 0x43b   :  { %v4124_v31 = vadd.f32 %v4122_v25, %v4119_v21 }
 0x43d   :  { %v4128_v33 = vadd.f32 %v4126_v26, %v4124_v31 }
 0x442   :  { %v4131_v35 = vpop.permute.xlu0 %4130 }
 0x443   :  { %v4133_v36 = vadd.f32 %v4131_v35, %v4128_v33  ;;  %v4140_v40 = vpop.permute.xlu1 %4139 }
 0x445   :  { %v4137_v38 = vadd.f32 %v4135_v48, %v4133_v36 }
 0x447   :  { %v4142_v44 = vadd.f32 %v4140_v40, %v4137_v38 }
 0x449   :  { %v4143_v47 = vadd.f32 %v4142_v44, %v4030_v8 }
 0x452   :  { %v4147_v49 = vpop.permute.xlu0 %4146 }
 0x453   :  { %v4149_v50 = vadd.f32 %v4147_v49, %v4143_v47  ;;  %v4156_v51 = vpop.permute.xlu1 %4155 }
 0x455   :  { %v4153_v6 = vadd.f32 %v4151_v60, %v4149_v50 }
 0x456   :  { %v4165_v52 = vpop.permute.xlu0 %4164 }
 0x457   :  { %v4158_v34 = vadd.f32 %v4156_v51, %v4153_v6  ;;  %v4174_v16 = vpop.permute.xlu1 %4173 }
 0x459   :  { %v4162_v42 = vadd.f32 %v4160_v30, %v4158_v34 }
 0x45a   :  { %v4275_v55 = vpop.permute.xlu0 %4274 }
 0x45b   :  { %v4167_v46 = vadd.f32 %v4165_v52, %v4162_v42  ;;  %4914 = vmatmul.mubr.msk.f32.vlgmr.msra.gmra.mrb[40].mxu0 %vm3778_vm8, %v4275_v55  ;;  %v4277_v1 = vpop.permute.xlu1 %4276 }
 0x45c   :  { %5408 = vmatpush1.bf16.msra.mxu0 %v6236_v61  ;;  %4352 = vmatprep.mubr.f32.mxu0 %v5499_v3 }
 0x45d   :  { %v4171_v0 = vadd.f32 %v4169_v59, %v4167_v46  ;;  %5410 = vmatprep.subr.bf16.mxu0 %v6238_v18 }
 0x45f   :  { %v4176_v2 = vadd.f32 %v4174_v16, %v4171_v0  ;;  %4915 = vmatmul.mubr.msk.f32.gmra.mrb[42].mxu0 %vm3778_vm8, %v4277_v1 }
 0x460   :  { %5412 = vmatpush1.bf16.msra.mxu0 %v6259_v23  ;;  %4496 = vmatprep.mubr.f32.mxu0 %v5499_v3 }
 0x461   :  { %v4177_v61 = vadd.f32 %v4176_v2, %v6357_v37  ;;  %5415 = vmatprep.subr.msk.bf16.mxu0 %vm6106_vm7, %v6262_v24 }
 0x463   :  { %v4178_v18 = vmax.f32 %v4177_v61, 0.0 }
 0x464   :  { %5418 = vmatpush1.bf16.msk.msra.mxu0 %vm6106_vm7, %v6273_v27 }
 0x465   :  { %5288 = vmatmul.mubr.msk.f32.vlgmr.msra.gmra.mrb[50].mxu1 %vm4179_vm9, %v4178_v18  ;;  %5433 = vmatprep.subr.bf16.mxu0 %v5505_v54 }
 0x466   :  { %5394 = vmatpush1.bf16.msra.mxu1 %v6159_v58  ;;  %4421 = vmatprep.mubr.f32.mxu1 %v5499_v3 }
 0x467   :  { %4922 = vmatmul.mubr.msk.f32.vlgmr.msra.gmra.mrb[44].mxu0 %vm3778_vm8, %v4275_v55  ;;  %5396 = vmatprep.subr.bf16.mxu1 %v6163_v62 }
 0x468   :  { %4500 = vmatprep.mubr.f32.mxu0 %v5499_v3  ;;  %5435 = vmatpush3.bf16.msra.mxu0 %v6303_v53 }
 0x469   :  { %5436 = vmatprep.subr.bf16.mxu0 %v5505_v54 }
 0x46a   :  { %5398 = vmatpush1.bf16.msra.mxu1 %v6183_v5 }
 0x46b   :  { %4923 = vmatmul.mubr.msk.f32.gmra.mrb[46].mxu0 %vm3778_vm8, %v4277_v1  ;;  %5401 = vmatprep.subr.msk.bf16.mxu1 %vm6106_vm7, %v6189_v7 }
 0x46c   :  { %5438 = vmatpush3.bf16.msra.mxu0 %v6314_v56  ;;  %5306 = vmatprep.mubr.msk.f32.mxu0 %vm5500_vm1, %v5499_v3 }
 0x46d   :  { %5439 = vmatprep.subr.bf16.mxu0 %v5505_v54 }
 0x46e   :  { %5404 = vmatpush1.bf16.msk.msra.mxu1 %vm6106_vm7, %v6209_v12 }
 0x46f   :  { %5420 = vmatprep.subr.bf16.mxu1 %v6052_v22 }
 0x470   :  { %5441 = vmatpush3.bf16.msra.mxu0 %v6324_v4 }
 0x471   :  { %4918 = vmatmul.mubr.msk.f32.vlgmr.msra.gmra.mrb[52].mxu1 %vm3778_vm8, %v4275_v55  ;;  %5442 = vmatprep.subr.bf16.mxu0 %v5505_v54 }
 0x472   :  { %5422 = vmatpush1.bf16.msra.mxu1 %v6072_v28  ;;  %4427 = vmatprep.mubr.f32.mxu1 %v5499_v3 }
 0x473   :  { %5424 = vmatprep.subr.bf16.mxu1 %v6074_v29 }
 0x474   :  { %5444 = vmatpush3.bf16.msra.mxu0 %v6335_v14 }
 0x475   :  { %4919 = vmatmul.mubr.msk.f32.gmra.mrb[54].mxu1 %vm3778_vm8, %v4277_v1 }
 0x476   :  { %5426 = vmatpush1.bf16.msra.mxu1 %v6084_v32  ;;  %4571 = vmatprep.mubr.f32.mxu1 %v5499_v3 }
 0x477   :  { %5429 = vmatprep.subr.msk.bf16.mxu1 %vm6106_vm7, %v6121_v43 }
 0x47a   :  { %5432 = vmatpush1.bf16.msk.msra.mxu1 %vm6106_vm7, %v6129_v45 }
 0x47d   :  { %4926 = vmatmul.mubr.msk.f32.vlgmr.msra.gmra.mrb[56].mxu1 %vm3778_vm8, %v4275_v55 }
 0x47e   :  { %4575 = vmatprep.mubr.f32.mxu1 %v5499_v3 }
 0x481   :  { %4927 = vmatmul.mubr.msk.f32.gmra.mrb[58].mxu1 %vm3778_vm8, %v4277_v1 }
 0x52e   :  { %v4348_v22 = vpop.f32.mrb[40].mxu0 }
 0x52f   :  { %v4583_v28 = vrot.slane %v4348_v22, 1  ;;  %v4350_v29 = vpop.f32.mrb[41].mxu0 }
 0x530   :  { %v4592_v32 = vrot.slane %v4350_v29, 3  ;;  %v4589_v17 = vrot.slane %v4350_v29, 2 }
 0x531   :  { %4584 = vrot.lane.b32.xlu0 %v4583_v28, %s5504_s5 }
 0x532   :  { %4593 = vrot.lane.b32.xlu1 %v4592_v32, %s5504_s5  ;;  %v4354_v58 = vpop.f32.mrb[42].mxu0 }
 0x533   :  { %v4355_v43 = vpop.f32.mrb[43].mxu0 }
 0x538   :  { %v4249_v62 = vpop.f32.mrb[50].mxu1 }
 0x539   :  { %v5289_v5 = vpop.f32.mrb[51].mxu1  ;;  %v4250_v14 = vadd.f32 %v4249_v62, %v3777_v13 }
 0x53a   :  { %v4498_v39 = vpop.f32.mrb[44].mxu0 }
 0x53b   :  { %v4499_v45 = vpop.f32.mrb[45].mxu0 }
 0x53e   :  { %v4502_v7 = vpop.f32.mrb[46].mxu0 }
 0x53f   :  { %v4504_v12 = vpop.f32.mrb[47].mxu0  ;;  %v4617_v53 = vrot.slane %v4502_v7, 1 }
 0x540   :  { %v4626_v56 = vrot.slane %v4504_v12, 3  ;;  %v4623_v47 = vrot.slane %v4504_v12, 2 }
 0x544   :  { %v4423_v23 = vpop.f32.mrb[52].mxu1 }
 0x545   :  { %v4601_v3 = vrot.slane %v4423_v23, 5  ;;  %v4425_v24 = vpop.f32.mrb[53].mxu1  ;;  %v4598_v21 = vrot.slane %v4423_v23, 4 }
 0x546   :  { %v4610_v27 = vrot.slane %v4425_v24, 7  ;;  %v4607_v33 = vrot.slane %v4425_v24, 6 }
 0x547   :  { %4602 = vrot.lane.b32.xlu0 %v4601_v3, %s5504_s5 }
 0x548   :  { %4611 = vrot.lane.b32.xlu1 %v4610_v27, %s5504_s5  ;;  %v4429_v41 = vpop.f32.mrb[54].mxu1 }
 0x549   :  { %v4430_v54 = vpop.f32.mrb[55].mxu1 }
 0x54b   :  { %4618 = vrot.lane.b32.xlu0 %v4617_v53, %s5504_s5 }
 0x54c   :  { %4627 = vrot.lane.b32.xlu1 %v4626_v56, %s5504_s5 }
 0x550   :  { %v4573_v4 = vpop.f32.mrb[56].mxu1 }
 0x551   :  { %v4574_v8 = vpop.f32.mrb[57].mxu1 }
 0x554   :  { %v4577_v9 = vpop.f32.mrb[58].mxu1 }
 0x555   :  { %v4635_v10 = vrot.slane %v4577_v9, 5  ;;  %v4579_v11 = vpop.f32.mrb[59].mxu1  ;;  %v4632_v51 = vrot.slane %v4577_v9, 4 }
 0x556   :  { %v4644_v57 = vrot.slane %v4579_v11, 7  ;;  %v4641_v34 = vrot.slane %v4579_v11, 6 }
 0x557   :  { %4636 = vrot.lane.b32.xlu0 %v4635_v10, %s5504_s5 }
 0x558   :  { %4645 = vrot.lane.b32.xlu1 %v4644_v57, %s5504_s5 }
 0x55b   :  { %4259 = vrot.lane.b32.xlu0 %v4250_v14, %s5497_s11 }
 0x5a3   :  { %v4585_v15 = vpop.permute.xlu0 %4584 }
 0x5a4   :  { %v4587_v19 = vadd.f32 %v4585_v15, %v4348_v22  ;;  %v4594_v20 = vpop.permute.xlu1 %4593 }
 0x5a6   :  { %v4591_v63 = vadd.f32 %v4589_v17, %v4587_v19 }
 0x5a8   :  { %v4596_v25 = vadd.f32 %v4594_v20, %v4591_v63 }
 0x5aa   :  { %v4600_v26 = vadd.f32 %v4598_v21, %v4596_v25 }
 0x5b9   :  { %v4603_v31 = vpop.permute.xlu0 %4602 }
 0x5ba   :  { %v4605_v35 = vadd.f32 %v4603_v31, %v4600_v26  ;;  %v4612_v36 = vpop.permute.xlu1 %4611 }
 0x5bc   :  { %v4609_v48 = vadd.f32 %v4607_v33, %v4605_v35 }
 0x5bd   :  { %v4619_v44 = vpop.permute.xlu0 %4618 }
 0x5be   :  { %v4614_v38 = vadd.f32 %v4612_v36, %v4609_v48  ;;  %v4628_v50 = vpop.permute.xlu1 %4627 }
 0x5c0   :  { %v4615_v40 = vadd.f32 %v4614_v38, %v4502_v7 }
 0x5c2   :  { %v4621_v49 = vadd.f32 %v4619_v44, %v4615_v40 }
 0x5c4   :  { %v4625_v60 = vadd.f32 %v4623_v47, %v4621_v49 }
 0x5c6   :  { %v4630_v6 = vadd.f32 %v4628_v50, %v4625_v60 }
 0x5c8   :  { %v4634_v52 = vadd.f32 %v4632_v51, %v4630_v6 }
 0x5c9   :  { %v4637_v30 = vpop.permute.xlu0 %4636 }
 0x5ca   :  { %v4639_v16 = vadd.f32 %v4637_v30, %v4634_v52  ;;  %v4646_v55 = vpop.permute.xlu1 %4645 }
 0x5cc   :  { %v4643_v42 = vadd.f32 %v4641_v34, %v4639_v16 }
 0x5cd   :  { %v4260_v59 = vpop.permute.xlu0 %4259 }
 0x5ce   :  { %v4648_v46 = vadd.f32 %v4646_v55, %v4643_v42  ;;  %v4263_v0 = vsel %vm4262_vm10, %v4260_v59, 0.0 }
 0x5cf   :  { %4264 = vadd.xlane.f32.xlu0 %v4263_v0 }
 0x5d0   :  { %v4649_v1 = vadd.f32 %v4648_v46, %v6357_v37 }
 0x5d2   :  { %v4650_v2 = vmax.f32 %v4649_v1, 0.0 }
 0x5d4   :  { %5307 = vmatmul.mubr.msk.f32.vlgmr.msra.gmra.mrb[48].mxu0 %vm4179_vm9, %v4650_v2 }
 0x5e5   :  { %4255 = vperm.xlu0 %5472, %v4250_v14  }
 0x65c   :  { %v4265_v61 = vpop.xlane.xlu0 %4264 }
 0x65d   :  { %v4267_v22 = vmul.f32 0.16666667, %v4265_v61 }
 0x664   :  { %v4256_v18 = vpop.permute.xlu0 %4255 }
 0x665   :  { %v4258_v28 = vadd.f32 %v4256_v18, %v4250_v14 }
 0x667   :  { %v4268_v29 = vsub.f32 %v4258_v28, %v4267_v22 }
 0x669   :  { %4270 = vrot.lane.b32.xlu0 %v4268_v29, %s5497_s11 }
 0x6a7   :  { %v4720_v32 = vpop.f32.mrb[48].mxu0 }
 0x6a8   :  { %v4721_v58 = vadd.f32 %v4720_v32, %v3777_v13  ;;  %v5308_v43 = vpop.f32.mrb[49].mxu0 }
 0x6aa   :  { %4730 = vrot.lane.b32.xlu1 %v4721_v58, %s5497_s11 }
 0x6db   :  { %v4271_v62 = vpop.permute.xlu0 %4270 }
 0x6dc   :  { %4273 = vst.msk [vmem:[#allocation3] sm:$0x1] %vm4262_vm10, %v4271_v62 }
 0x71c   :  { %v4731_v37 = vpop.permute.xlu1 %4730 }
 0x71d   :  { %v4733_v5 = vsel %vm4262_vm10, %v4731_v37, 0.0 }
 0x71e   :  { %4734 = vadd.xlane.f32.xlu1 %v4733_v5 }
 0x72f   :  { %4726 = vperm.xlu1 %5471, %v4721_v58  }
 0x7ab   :  { %v4735_v39 = vpop.xlane.xlu1 %4734 }
 0x7ac   :  { %v4736_v7 = vmul.f32 0.16666667, %v4735_v39 }
 0x7af   :  { %v4727_v45 = vpop.permute.xlu1 %4726 }
 0x7b0   :  { %v4729_v12 = vadd.f32 %v4727_v45, %v4721_v58 }
 0x7b2   :  { %v4737_v23 = vsub.f32 %v4729_v12, %v4736_v7 }
 0x7b4   :  { %4739 = vrot.lane.b32.xlu1 %v4737_v23, %s5497_s11 }
 0x826   :  { %v4740_v3 = vpop.permute.xlu1 %4739 }
 0x827   :  { %4742 = vst.msk [vmem:[#allocation3 + $0x1] sm:$0x1] %vm4262_vm10, %v4740_v3 }
 0x828   :  { %5484 = shalt.err (!%p5481_p4)
}
 0x829   :  { %s5485_s15 = scalar_lea.hbm %s6452_s9, 32 }
 0x82a   :  { %p5486_p5 = scmp.ne.s32.totalorder %s6452_s9, %s5485_s15  ;;  %p5489_p6 = scmp.lt.u32.totalorder %s5485_s15, %s6452_s9 }
 0x82c   :  { %p5491_p7 = pnand %p5489_p6, %p5486_p5 }
 0x82e   :  { %5494 = shalt.err (!%p5491_p7)
}
 0x82f   :  { %4752 = dma.vmem_to_hbm [thread:$0]  %s4750_s30, 32, %s6452_s9, [#allocation4]  }
 0x830   :  { %5495 = dma.done.wait [#allocation4], 32  }
 0x831   :  { %5496 = vsyncadd [#allocation4], 4294967264 }
 0x832   :  { %4756 = vsyncpa [#allocation4], 1 }

</bundles_post_ra>
